<compile_context>
chip_gen: v7x
topology: tpu7x:2x2x1
jax: 0.10.0
libtpu: 0.0.40
codegen_flags: <defaults>
</compile_context>

<pallas_src>
import functools

import numpy as np
import jax
import jax.numpy as jnp
from jax import lax
from jax.experimental import pallas as pl
from jax.experimental.pallas import tpu as pltpu


def _cdiv(a, b):
    return (a + b - 1) // b


# --------------------------------- kernel -------------------------------------

def _clam_sb_kernel(h_ref, w1_ref, b1_ref, wab_ref, bab_ref, wc_ref, bc_ref,
                    scores_ref, m_out_ref, l_out_ref, macc_out_ref,
                    m_run, l_run, macc,
                    *, n_valid, d_attn):
    c = pl.program_id(0)                     # split index (one per TensorCore on v7x)
    t = pl.program_id(1)                     # tile index inside this split
    n_split = pl.num_programs(0)
    n_inner = pl.num_programs(1)
    tile_n = h_ref.shape[0]

    g = t * n_split + c                      # global tile index (interleaved split)
    row0 = g * tile_n

    @pl.when(t == 0)
    def _init():
        m_run[...] = jnp.full_like(m_run, -1e30)
        l_run[...] = jnp.zeros_like(l_run)
        macc[...] = jnp.zeros_like(macc)

    # fc: Linear(feat -> hidden) + ReLU   (bf16 MXU inputs, f32 accumulation)
    h = h_ref[...].astype(jnp.bfloat16)                                    # (T, F)
    h1 = jnp.dot(h, w1_ref[...], preferred_element_type=jnp.float32) + b1_ref[...]
    h1 = jnp.maximum(h1, 0.0)                                              # (T, H) f32

    # Rows past the end of the bag (partial / fully-masked tiles) were read as
    # garbage from HBM: zero them so they cannot poison any accumulation.
    valid_rows = (lax.broadcasted_iota(jnp.int32, (tile_n, 1), 0) + row0) < n_valid
    h1 = jnp.where(valid_rows, h1, 0.0)

    # Attn_Net_Gated: one fused matmul against [Wa | Wb]; elementwise gating in bf16.
    h1b = h1.astype(jnp.bfloat16)
    xab = (jnp.dot(h1b, wab_ref[...], preferred_element_type=jnp.float32)
           + bab_ref[...]).astype(jnp.bfloat16)                            # (T, 2D)
    a = jnp.tanh(xab[:, :d_attn])
    # sigmoid(x) == 0.5 * (tanh(0.5 x) + 1): one EUP transcendental instead of exp+rcp.
    gate = (jnp.tanh(xab[:, d_attn:] * 0.5) + 1.0) * 0.5
    ab = a * gate                                                          # (T, D) bf16

    # attention_c: Linear(D -> 1), contracted on the MXU directly into ROW layout:
    # (1, D) . (T, D)^T -> (1, T), so the scores store is lane-dense (no transpose).
    s_row = lax.dot_general(wc_ref[...], ab, (((1,), (1,)), ((), ())),
                            preferred_element_type=jnp.float32) + bc_ref[...]

    valid_cols = (lax.broadcasted_iota(jnp.int32, (1, tile_n), 1) + row0) < n_valid
    s_row = jnp.where(valid_cols, s_row, -1e30)
    scores_ref[...] = s_row                                                # (1, T)

    # Online softmax over instances + bag-feature accumulation (all f32).
    m_prev = m_run[...]                                                    # (1, 1)
    m_new = jnp.maximum(m_prev, jnp.max(s_row, axis=-1, keepdims=True))
    alpha = jnp.exp(m_prev - m_new)
    p_row = jnp.where(valid_cols, jnp.exp(s_row - m_new), 0.0)             # (1, T)
    l_run[...] = alpha * l_run[...] + jnp.sum(p_row, axis=-1, keepdims=True)
    macc[...] = alpha * macc[...] + jnp.dot(p_row, h1,
                                            preferred_element_type=jnp.float32)
    m_run[...] = m_new

    @pl.when(t == n_inner - 1)
    def _finalize():
        m_out_ref[...] = jnp.broadcast_to(m_run[...], m_out_ref.shape)
        l_out_ref[...] = jnp.broadcast_to(l_run[...], l_out_ref.shape)
        macc_out_ref[...] = jnp.broadcast_to(macc[...], macc_out_ref.shape)


# --------------------------------- wrapper ------------------------------------

def _vmem_bytes_estimate(tile_n, feat, hidden, d_attn, in_bytes):
    h_stream = 2 * tile_n * feat * in_bytes                   # double-buffered h tile
    interm = tile_n * (2 * feat + 6 * hidden + 18 * d_attn)   # bf16 h, h1, xab/a/gate/ab
    weights = (2 * (feat * hidden + 2 * hidden * d_attn + d_attn)
               + 4 * (hidden + 2 * d_attn + 2))
    return h_stream + interm + weights + (2 << 20)


@functools.partial(jax.jit, static_argnames=("tile_n", "vmem_budget_bytes"))
def clam_sb_pallas(h, params, *, tile_n=2048, vmem_budget_bytes=48 * 1024 * 1024):
    """Bag path of CLAM_SB. Returns (logits (1,C), raw scores (1,N), bag feature M (1,H))."""
    N, F = h.shape
    H = params["w1"].shape[1]
    D = params["wa"].shape[1]
    in_bytes = jnp.dtype(h.dtype).itemsize

    # --- tiling / split selection (static, shape-based) ---------------------
    if N <= tile_n:
        tile = N                                   # single full tile (block == array)
        n_tiles = 1
    else:
        tile = max(128, (tile_n // 128) * 128)     # big, lane-aligned tiles
        # shrink until the streaming working set fits the VMEM budget (v7x: 64 MiB phys)
        while (tile > 128 and
               _vmem_bytes_estimate(tile, F, H, D, in_bytes) > vmem_budget_bytes):
            tile = max(128, (tile // 2) // 128 * 128)
        n_tiles = _cdiv(N, tile)
    n_split = 2 if n_tiles >= 2 else 1             # feed both TensorCores on v7x
    n_inner = _cdiv(n_tiles, n_split)
    n_pad = n_split * n_inner * tile
    n_last = n_tiles - 1

    vmem_limit = int(max(32 * 1024 * 1024,
                         min(vmem_budget_bytes,
                             2 * _vmem_bytes_estimate(tile, F, H, D, in_bytes))))

    # --- VMEM-resident weights (bf16 matmul operands, f32 biases) -----------
    w1 = params["w1"].astype(jnp.bfloat16)                                 # (F, H)
    b1 = params["b1"].reshape(1, H).astype(jnp.float32)
    wab = jnp.concatenate([params["wa"], params["wb"]], axis=1).astype(jnp.bfloat16)
    bab = jnp.concatenate([params["ba"].reshape(1, D),
                           params["bb"].reshape(1, D)], axis=1).astype(jnp.float32)
    wc = params["wc"].reshape(1, D).astype(jnp.bfloat16)
    bc = params["bc"].reshape(1, 1).astype(jnp.float32)
    # TODO(synk): optional fp8 path for h/W1 on v7x was not adopted (needs accuracy study).

    const = lambda c, t: (0, 0)

    def h_map(c, t):
        # interleave tiles between the two splits; clamp fully out-of-range tiles
        # onto the last real block (their rows are masked inside the kernel).
        return (jnp.minimum(t * n_split + c, n_last), 0)

    def s_map(c, t):
        return (0, t * n_split + c)

    stat_map = lambda c, t: (c, 0, 0)

    in_specs = [pl.BlockSpec((tile, F), h_map)] + [
        pl.BlockSpec(w.shape, const) for w in (w1, b1, wab, bab, wc, bc)]

    out_shapes = (
        jax.ShapeDtypeStruct((1, n_pad), jnp.float32),          # raw scores (lane-dense)
        jax.ShapeDtypeStruct((n_split, 1, 128), jnp.float32),   # per-split running max
        jax.ShapeDtypeStruct((n_split, 1, 128), jnp.float32),   # per-split running sum
        jax.ShapeDtypeStruct((n_split, 1, H), jnp.float32),     # per-split sum_i p_i*h1_i
    )
    out_specs = [
        pl.BlockSpec((1, tile), s_map),
        pl.BlockSpec((1, 1, 128), stat_map),
        pl.BlockSpec((1, 1, 128), stat_map),
        pl.BlockSpec((1, 1, H), stat_map),
    ]

    flops = 2 * n_pad * (F * H + H * 2 * D + 2 * D + H)
    transcendentals = n_pad * (2 * D + 1)
    bytes_accessed = (N * F * in_bytes
                      + 2 * (F * H + 2 * H * D + D)
                      + 4 * (n_pad + n_split * (256 + H)))

    kernel = functools.partial(_clam_sb_kernel, n_valid=N, d_attn=D)

    scores, m_half, l_half, macc_half = pl.pallas_call(
        kernel,
        out_shape=out_shapes,
        grid_spec=pltpu.PrefetchScalarGridSpec(
            num_scalar_prefetch=0,
            grid=(n_split, n_inner),
            in_specs=in_specs,
            out_specs=out_specs,
            scratch_shapes=[
                pltpu.VMEM((1, 1), jnp.float32),    # running max
                pltpu.VMEM((1, 1), jnp.float32),    # running sum
                pltpu.VMEM((1, H), jnp.float32),    # running sum_i p_i * h1_i
            ],
        ),
        compiler_params=pltpu.CompilerParams(
            dimension_semantics=("parallel", "arbitrary"),
            vmem_limit_bytes=vmem_limit,
        ),
        cost_estimate=pl.CostEstimate(flops=flops,
                                      transcendentals=transcendentals,
                                      bytes_accessed=bytes_accessed),
    )(h, w1, b1, wab, bab, wc, bc)

    # --- exact merge of the per-split online-softmax partials (tiny, f32) ----
    m_h = m_half[:, 0, 0]                        # (n_split,)
    l_h = l_half[:, 0, 0]                        # (n_split,)
    acc_h = macc_half[:, 0, :]                   # (n_split, H)
    m_tot = jnp.max(m_h)
    w_h = jnp.exp(m_h - m_tot)                   # empty split -> weight 0
    l_tot = jnp.sum(w_h * l_h)
    M = jnp.sum(w_h[:, None] * acc_h, axis=0, keepdims=True) / l_tot       # (1, H)

    logits = M @ params["wcls"] + params["bcls"].reshape(1, -1)             # (1, C)
    raw_scores = scores[:, :N]                                              # (1, N)
    return logits, raw_scores, M


# ------------------------------- parameters -----------------------------------

def xavier_normal(key, shape_in_out):
    fan_in, fan_out = shape_in_out
    std = float(np.sqrt(2.0 / (fan_in + fan_out)))
    return std * jax.random.normal(key, shape_in_out, dtype=jnp.float32)


def init_params(key, feat_dim, hidden, D, n_classes):
    ks = jax.random.split(key, 5 + n_classes)
    return {
        "w1":   xavier_normal(ks[0], (feat_dim, hidden)),
        "b1":   jnp.zeros((1, hidden), jnp.float32),
        "wa":   xavier_normal(ks[1], (hidden, D)),
        "ba":   jnp.zeros((1, D), jnp.float32),
        "wb":   xavier_normal(ks[2], (hidden, D)),
        "bb":   jnp.zeros((1, D), jnp.float32),
        "wc":   xavier_normal(ks[3], (1, D)),            # attention_c weight row
        "bc":   jnp.zeros((1, 1), jnp.float32),
        "wcls": xavier_normal(ks[4], (hidden, n_classes)),
        "bcls": jnp.zeros((1, n_classes), jnp.float32),
        # instance classifiers: n_classes x Linear(hidden, 2)
        "inst_w": [xavier_normal(ks[5 + i], (hidden, 2)) for i in range(n_classes)],
        "inst_b": [jnp.zeros((2,), jnp.float32) for _ in range(n_classes)],
    }


# ----------------------------- instance-eval glue ------------------------------

def _post_fc_rows(h_rows, params):
    # recompute post-fc features only for the handful of selected instances
    return jax.nn.relu(h_rows @ params["w1"] + params["b1"])


def inst_eval(A_row, h, params, wi, bi, k):
    _, top_p_ids = jax.lax.top_k(A_row[-1], k)
    _, top_n_ids = jax.lax.top_k(-A_row[-1], k)
    sel = jnp.concatenate([top_p_ids, top_n_ids], axis=0)
    inst_feats = _post_fc_rows(h[sel], params)                      # (2k, H)
    all_targets = jnp.concatenate(
        [jnp.ones((k,), jnp.int32), jnp.zeros((k,), jnp.int32)], axis=0)
    logits_inst = inst_feats @ wi + bi
    all_preds = jnp.argmax(logits_inst, axis=1)
    # TODO(synk): SmoothTop1SVM instance loss is an external (undefined) dependency;
    # returning 0.0 placeholder instead of the smooth top-1 SVM loss.
    instance_loss = jnp.float32(0.0)
    return instance_loss, all_preds, all_targets


def inst_eval_out(A_row, h, params, wi, bi, k):
    _, top_p_ids = jax.lax.top_k(A_row[-1], k)
    inst_feats = _post_fc_rows(h[top_p_ids], params)                # (k, H)
    p_targets = jnp.zeros((k,), jnp.int32)
    logits_inst = inst_feats @ wi + bi
    p_preds = jnp.argmax(logits_inst, axis=1)
    # TODO(synk): SmoothTop1SVM instance loss placeholder (external dependency).
    instance_loss = jnp.float32(0.0)
    return instance_loss, p_preds, p_targets


def clam_sb_forward(h, label, params, *, k_sample=8, n_classes=2,
                    subtyping=False, instance_eval=True,
                    return_global_feature=False, tile_n=2048):
    logits, raw_scores, M = clam_sb_pallas(h, params, tile_n=tile_n)
    A_row = jax.nn.softmax(raw_scores, axis=1)       # (1, N) == F.softmax(A.T, dim=1)

    results_dict = {}
    if instance_eval:
        k = k_sample
        if A_row.shape[1] < 2 * k_sample:
            k = (A_row.shape[1] - 1) // 2
        total_inst_loss = jnp.float32(0.0)
        all_preds, all_targets = [], []
        inst_labels = np.eye(n_classes, dtype=np.int32)[int(label)]
        for i in range(n_classes):
            if int(inst_labels[i]) == 1:
                loss_i, preds_i, tgts_i = inst_eval(
                    A_row, h, params, params["inst_w"][i], params["inst_b"][i], k)
            elif subtyping:
                loss_i, preds_i, tgts_i = inst_eval_out(
                    A_row, h, params, params["inst_w"][i], params["inst_b"][i], k)
            else:
                continue
            all_preds.extend(np.asarray(preds_i))
            all_targets.extend(np.asarray(tgts_i))
            total_inst_loss = total_inst_loss + loss_i
        if subtyping:
            total_inst_loss = total_inst_loss / n_classes
        results_dict = {"instance_loss": total_inst_loss,
                        "inst_labels": np.array(all_targets),
                        "inst_preds": np.array(all_preds)}

    Y_hat = jnp.argmax(logits, axis=1)[:, None]
    Y_prob = jax.nn.softmax(logits, axis=1)

    if return_global_feature:
        return M, results_dict
    return logits, Y_prob, Y_hat, results_dict


# --------------------------------- reference -----------------------------------

def _reference_bag_path(h, params):
    # pure-JAX reference using the same bf16 matmul precision as the kernel,
    # but f32 tanh/sigmoid elementwise.
    hb = h.astype(jnp.bfloat16)
    h1 = jax.nn.relu(jnp.dot(hb, params["w1"].astype(jnp.bfloat16),
                             preferred_element_type=jnp.float32) + params["b1"])
    h1b = h1.astype(jnp.bfloat16)
    xa = jnp.dot(h1b, params["wa"].astype(jnp.bfloat16),
                 preferred_element_type=jnp.float32) + params["ba"]
    xb = jnp.dot(h1b, params["wb"].astype(jnp.bfloat16),
                 preferred_element_type=jnp.float32) + params["bb"]
    ab = jnp.tanh(xa) * jax.nn.sigmoid(xb)
    s = ab @ params["wc"].T + params["bc"]                                  # (N, 1)
    A_row = jax.nn.softmax(s.T, axis=1)                                     # (1, N)
    M = A_row @ h1
    logits = M @ params["wcls"] + params["bcls"]
    return logits, A_row, M


if __name__ == "__main__":
    # Small, module-consistent shapes: feat_dim=256, hidden_feat=128,
    # attention dim D=256 ('small'), n_classes=2.
    FEAT, HIDDEN, D, NCLS = 256, 128, 256, 2

    key = jax.random.PRNGKey(0)
    k_param, k_data = jax.random.split(key)
    params = init_params(k_param, FEAT, HIDDEN, D, NCLS)

    # (bag size N, tile_n) configs exercising: single-full-tile, 2-way split with a
    # partial last tile, and an odd tile count (one fully-masked, clamped tile).
    configs = [(200, 2048), (200, 128), (300, 128)]
    for (N, tile) in configs:
        h = jax.random.normal(jax.random.fold_in(k_data, N), (N, FEAT),
                              dtype=jnp.float32)
        logits_k, scores_k, M_k = clam_sb_pallas(h, params, tile_n=tile)
        jax.block_until_ready((logits_k, scores_k, M_k))

        logits_r, A_r, M_r = _reference_bag_path(h, params)
        A_k = jax.nn.softmax(scores_k, axis=1)
        np.testing.assert_allclose(np.asarray(A_k), np.asarray(A_r),
                                   rtol=5e-2, atol=5e-4)
        np.testing.assert_allclose(np.asarray(M_k), np.asarray(M_r),
                                   rtol=6e-2, atol=6e-2)
        np.testing.assert_allclose(np.asarray(logits_k), np.asarray(logits_r),
                                   rtol=6e-2, atol=6e-2)

    # Full forward with instance-eval glue (reuses the compiled N=200/tile=128 kernel).
    N, TILE = 200, 128
    h = jax.random.normal(jax.random.fold_in(k_data, N), (N, FEAT), dtype=jnp.float32)
    logits, Y_prob, Y_hat, results = clam_sb_forward(h, 1, params, tile_n=TILE)
    jax.block_until_ready((logits, Y_prob, Y_hat))

    assert logits.shape == (1, NCLS)
    assert Y_prob.shape == (1, NCLS)
    assert Y_hat.shape == (1, 1)
    assert results["inst_preds"].shape == (16,)   # 2 * k_sample

    print("KERNEL_OK")
</pallas_src>

<mosaic_0001>
module attributes {stable_mosaic.version = 11 : i64} {
  func.func @_clam_sb_kernel(%arg0: i32, %arg1: i32, %arg2: memref<200x256xf32, #tpu.memory_space<vmem>>, %arg3: memref<256x128xbf16, #tpu.memory_space<vmem>>, %arg4: memref<1x128xf32, #tpu.memory_space<vmem>>, %arg5: memref<128x512xbf16, #tpu.memory_space<vmem>>, %arg6: memref<1x512xf32, #tpu.memory_space<vmem>>, %arg7: memref<1x256xbf16, #tpu.memory_space<vmem>>, %arg8: memref<1x1xf32, #tpu.memory_space<vmem>>, %arg9: memref<1x200xf32, #tpu.memory_space<vmem>>, %arg10: memref<1x1x128xf32, #tpu.memory_space<vmem>>, %arg11: memref<1x1x128xf32, #tpu.memory_space<vmem>>, %arg12: memref<1x1x128xf32, #tpu.memory_space<vmem>>, %arg13: memref<1x1xf32, #tpu.memory_space<vmem>>, %arg14: memref<1x1xf32, #tpu.memory_space<vmem>>, %arg15: memref<1x128xf32, #tpu.memory_space<vmem>>) attributes {dimension_semantics = [#tpu.dimension_semantics<parallel>, #tpu.dimension_semantics<arbitrary>], iteration_bounds = array<i64: 1, 1>, scalar_prefetch = 0 : i64, scratch_operands = 3 : i64, tpu.core_type = #tpu.core_type<tc>, window_params = [{transform_indices = @transform_0, window_bounds = array<i64: 200, 256>}, {pipeline_mode = #tpu.pipeline_mode<synchronous>, transform_indices = @transform_1, window_bounds = array<i64: 256, 128>}, {pipeline_mode = #tpu.pipeline_mode<synchronous>, transform_indices = @transform_2, window_bounds = array<i64: 1, 128>}, {pipeline_mode = #tpu.pipeline_mode<synchronous>, transform_indices = @transform_3, window_bounds = array<i64: 128, 512>}, {pipeline_mode = #tpu.pipeline_mode<synchronous>, transform_indices = @transform_4, window_bounds = array<i64: 1, 512>}, {pipeline_mode = #tpu.pipeline_mode<synchronous>, transform_indices = @transform_5, window_bounds = array<i64: 1, 256>}, {pipeline_mode = #tpu.pipeline_mode<synchronous>, transform_indices = @transform_6, window_bounds = array<i64: 1, 1>}, {transform_indices = @transform_7, window_bounds = array<i64: 1, 200>}, {transform_indices = @transform_8, window_bounds = array<i64: 1, 1, 128>}, {transform_indices = @transform_9, window_bounds = array<i64: 1, 1, 128>}, {transform_indices = @transform_10, window_bounds = array<i64: 1, 1, 128>}]} {
    %c1_i32 = arith.constant 1 : i32
    %0 = arith.muli %arg1, %c1_i32 : i32
    %1 = arith.addi %0, %arg0 : i32
    %c200_i32 = arith.constant 200 : i32
    %2 = arith.muli %1, %c200_i32 : i32
    %c0_i32 = arith.constant 0 : i32
    %3 = arith.cmpi eq, %arg1, %c0_i32 : i32
    %4 = arith.extui %3 : i1 to i32
    %c0_i32_0 = arith.constant 0 : i32
    %5 = arith.cmpi ne, %4, %c0_i32_0 : i32
    scf.if %5 {
      %cst_44 = arith.constant -1.000000e+30 : f32
      %82 = vector.broadcast %cst_44 : f32 to vector<1x1xf32>
      %c0_45 = arith.constant 0 : index
      %c0_46 = arith.constant 0 : index
      %83 = vector.load %arg13[%c0_45, %c0_46] : memref<1x1xf32, #tpu.memory_space<vmem>>, vector<1x1xf32>
      tpu.vector_store %arg13[%c0_45, %c0_46], %82 {strides = array<i32>} : memref<1x1xf32, #tpu.memory_space<vmem>>, vector<1x1xf32>,
      %cst_47 = arith.constant 0.000000e+00 : f32
      %84 = vector.broadcast %cst_47 : f32 to vector<1x1xf32>
      %c0_48 = arith.constant 0 : index
      %c0_49 = arith.constant 0 : index
      %85 = vector.load %arg14[%c0_48, %c0_49] : memref<1x1xf32, #tpu.memory_space<vmem>>, vector<1x1xf32>
      tpu.vector_store %arg14[%c0_48, %c0_49], %84 {strides = array<i32>} : memref<1x1xf32, #tpu.memory_space<vmem>>, vector<1x1xf32>,
      %cst_50 = arith.constant 0.000000e+00 : f32
      %86 = vector.broadcast %cst_50 : f32 to vector<1x128xf32>
      %c0_51 = arith.constant 0 : index
      %c0_52 = arith.constant 0 : index
      %87 = vector.load %arg15[%c0_51, %c0_52] : memref<1x128xf32, #tpu.memory_space<vmem>>, vector<1x128xf32>
      tpu.vector_store %arg15[%c0_51, %c0_52], %86 {strides = array<i32>} : memref<1x128xf32, #tpu.memory_space<vmem>>, vector<1x128xf32>,
    } else {
    }
    %c0 = arith.constant 0 : index
    %c0_1 = arith.constant 0 : index
    %6 = vector.load %arg2[%c0, %c0_1] : memref<200x256xf32, #tpu.memory_space<vmem>>, vector<200x256xf32>
    %7 = arith.truncf %6 : vector<200x256xf32> to vector<200x256xbf16>
    %c0_2 = arith.constant 0 : index
    %c0_3 = arith.constant 0 : index
    %8 = vector.load %arg3[%c0_2, %c0_3] : memref<256x128xbf16, #tpu.memory_space<vmem>>, vector<256x128xbf16>
    %cst = arith.constant dense<0.000000e+00> : vector<200x128xf32>
    %9 = tpu.matmul %7, %8, %cst {dimension_numbers = #tpu.dot_dimension_numbers<[1], [0], [0], [1], [0, 0, 1, 1], [], []>} : vector<200x256xbf16>, vector<256x128xbf16>, vector<200x128xf32> -> vector<200x128xf32>
    %c0_4 = arith.constant 0 : index
    %c0_5 = arith.constant 0 : index
    %10 = vector.load %arg4[%c0_4, %c0_5] : memref<1x128xf32, #tpu.memory_space<vmem>>, vector<1x128xf32>
    %11 = vector.broadcast %10 : vector<1x128xf32> to vector<200x128xf32>
    %12 = arith.addf %9, %11 : vector<200x128xf32>
    %cst_6 = arith.constant 0.000000e+00 : f32
    %13 = vector.broadcast %cst_6 : f32 to vector<200x128xf32>
    %14 = arith.maximumf %12, %13 : vector<200x128xf32>
    %15 = tpu.iota {dimensions = array<i32: 0>} : vector<200x1xi32>
    %16 = vector.broadcast %2 : i32 to vector<200x1xi32>
    %17 = arith.addi %15, %16 : vector<200x1xi32>
    %c200_i32_7 = arith.constant 200 : i32
    %18 = vector.broadcast %c200_i32_7 : i32 to vector<200x1xi32>
    %19 = arith.cmpi slt, %17, %18 : vector<200x1xi32>
    %cst_8 = arith.constant 0.000000e+00 : f32
    %20 = vector.shape_cast %19 : vector<200x1xi1> to vector<200x1xi1>
    %21 = vector.broadcast %20 : vector<200x1xi1> to vector<200x128xi1>
    %22 = vector.broadcast %cst_8 : f32 to vector<200x128xf32>
    %23 = arith.select %21, %14, %22 : vector<200x128xi1>, vector<200x128xf32>
    %24 = arith.truncf %23 : vector<200x128xf32> to vector<200x128xbf16>
    %c0_9 = arith.constant 0 : index
    %c0_10 = arith.constant 0 : index
    %25 = vector.load %arg5[%c0_9, %c0_10] : memref<128x512xbf16, #tpu.memory_space<vmem>>, vector<128x512xbf16>
    %cst_11 = arith.constant dense<0.000000e+00> : vector<200x512xf32>
    %26 = tpu.matmul %24, %25, %cst_11 {dimension_numbers = #tpu.dot_dimension_numbers<[1], [0], [0], [1], [0, 0, 1, 1], [], []>} : vector<200x128xbf16>, vector<128x512xbf16>, vector<200x512xf32> -> vector<200x512xf32>
    %c0_12 = arith.constant 0 : index
    %c0_13 = arith.constant 0 : index
    %27 = vector.load %arg6[%c0_12, %c0_13] : memref<1x512xf32, #tpu.memory_space<vmem>>, vector<1x512xf32>
    %28 = vector.broadcast %27 : vector<1x512xf32> to vector<200x512xf32>
    %29 = arith.addf %26, %28 : vector<200x512xf32>
    %30 = arith.truncf %29 : vector<200x512xf32> to vector<200x512xbf16>
    %31 = vector.extract_strided_slice %30 {offsets = [0, 0], sizes = [200, 256], strides = [1, 1]} : vector<200x512xbf16> to vector<200x256xbf16>
    %32 = math.tanh %31 : vector<200x256xbf16>
    %33 = vector.extract_strided_slice %30 {offsets = [0, 256], sizes = [200, 256], strides = [1, 1]} : vector<200x512xbf16> to vector<200x256xbf16>
    %cst_14 = arith.constant 5.000000e-01 : bf16
    %34 = vector.broadcast %cst_14 : bf16 to vector<200x256xbf16>
    %35 = arith.mulf %33, %34 : vector<200x256xbf16>
    %36 = math.tanh %35 : vector<200x256xbf16>
    %cst_15 = arith.constant 1.000000e+00 : bf16
    %37 = vector.broadcast %cst_15 : bf16 to vector<200x256xbf16>
    %38 = arith.addf %36, %37 : vector<200x256xbf16>
    %cst_16 = arith.constant 5.000000e-01 : bf16
    %39 = vector.broadcast %cst_16 : bf16 to vector<200x256xbf16>
    %40 = arith.mulf %38, %39 : vector<200x256xbf16>
    %41 = arith.mulf %32, %40 : vector<200x256xbf16>
    %c0_17 = arith.constant 0 : index
    %c0_18 = arith.constant 0 : index
    %42 = vector.load %arg7[%c0_17, %c0_18] : memref<1x256xbf16, #tpu.memory_space<vmem>>, vector<1x256xbf16>
    %cst_19 = arith.constant dense<0.000000e+00> : vector<1x200xf32>
    %43 = tpu.matmul %42, %41, %cst_19 {dimension_numbers = #tpu.dot_dimension_numbers<[1], [1], [0], [0], [0, 0, 1, 0], [], []>} : vector<1x256xbf16>, vector<200x256xbf16>, vector<1x200xf32> -> vector<1x200xf32>
    %c0_20 = arith.constant 0 : index
    %c0_21 = arith.constant 0 : index
    %44 = vector.load %arg8[%c0_20, %c0_21] : memref<1x1xf32, #tpu.memory_space<vmem>>, vector<1x1xf32>
    %45 = vector.broadcast %44 : vector<1x1xf32> to vector<1x200xf32>
    %46 = arith.addf %43, %45 : vector<1x200xf32>
    %47 = tpu.iota {dimensions = array<i32: 1>} : vector<1x200xi32>
    %48 = vector.broadcast %2 : i32 to vector<1x200xi32>
    %49 = arith.addi %47, %48 : vector<1x200xi32>
    %c200_i32_22 = arith.constant 200 : i32
    %50 = vector.broadcast %c200_i32_22 : i32 to vector<1x200xi32>
    %51 = arith.cmpi slt, %49, %50 : vector<1x200xi32>
    %cst_23 = arith.constant -1.000000e+30 : f32
    %52 = vector.broadcast %cst_23 : f32 to vector<1x200xf32>
    %53 = arith.select %51, %46, %52 : vector<1x200xi1>, vector<1x200xf32>
    %c0_24 = arith.constant 0 : index
    %c0_25 = arith.constant 0 : index
    %54 = vector.load %arg9[%c0_24, %c0_25] : memref<1x200xf32, #tpu.memory_space<vmem>>, vector<1x200xf32>
    tpu.vector_store %arg9[%c0_24, %c0_25], %53 {strides = array<i32>} : memref<1x200xf32, #tpu.memory_space<vmem>>, vector<1x200xf32>,
    %c0_26 = arith.constant 0 : index
    %c0_27 = arith.constant 0 : index
    %55 = vector.load %arg13[%c0_26, %c0_27] : memref<1x1xf32, #tpu.memory_space<vmem>>, vector<1x1xf32>
    %cst_28 = arith.constant dense<0xFF800000> : vector<1xf32>
    %56 = vector.multi_reduction <maximumf>, %53, %cst_28 [1] : vector<1x200xf32> to vector<1xf32>
    %57 = vector.shape_cast %56 : vector<1xf32> to vector<1x1xf32>
    %58 = arith.maximumf %55, %57 : vector<1x1xf32>
    %59 = arith.subf %55, %58 : vector<1x1xf32>
    %60 = math.exp %59 : vector<1x1xf32>
    %61 = vector.broadcast %58 : vector<1x1xf32> to vector<1x200xf32>
    %62 = arith.subf %53, %61 : vector<1x200xf32>
    %63 = math.exp %62 : vector<1x200xf32>
    %cst_29 = arith.constant 0.000000e+00 : f32
    %64 = vector.broadcast %cst_29 : f32 to vector<1x200xf32>
    %65 = arith.select %51, %63, %64 : vector<1x200xi1>, vector<1x200xf32>
    %c0_30 = arith.constant 0 : index
    %c0_31 = arith.constant 0 : index
    %66 = vector.load %arg14[%c0_30, %c0_31] : memref<1x1xf32, #tpu.memory_space<vmem>>, vector<1x1xf32>
    %67 = arith.mulf %60, %66 : vector<1x1xf32>
    %cst_32 = arith.constant dense<0.000000e+00> : vector<1xf32>
    %68 = vector.multi_reduction <add>, %65, %cst_32 [1] : vector<1x200xf32> to vector<1xf32>
    %69 = vector.shape_cast %68 : vector<1xf32> to vector<1x1xf32>
    %70 = arith.addf %67, %69 : vector<1x1xf32>
    %c0_33 = arith.constant 0 : index
    %c0_34 = arith.constant 0 : index
    %71 = vector.load %arg14[%c0_33, %c0_34] : memref<1x1xf32, #tpu.memory_space<vmem>>, vector<1x1xf32>
    tpu.vector_store %arg14[%c0_33, %c0_34], %70 {strides = array<i32>} : memref<1x1xf32, #tpu.memory_space<vmem>>, vector<1x1xf32>,
    %c0_35 = arith.constant 0 : index
    %c0_36 = arith.constant 0 : index
    %72 = vector.load %arg15[%c0_35, %c0_36] : memref<1x128xf32, #tpu.memory_space<vmem>>, vector<1x128xf32>
    %73 = vector.broadcast %60 : vector<1x1xf32> to vector<1x128xf32>
    %74 = arith.mulf %73, %72 : vector<1x128xf32>
    %cst_37 = arith.constant dense<0.000000e+00> : vector<1x128xf32>
    %75 = tpu.matmul %65, %23, %cst_37 {dimension_numbers = #tpu.dot_dimension_numbers<[1], [0], [0], [1], [0, 0, 1, 1], [], []>} : vector<1x200xf32>, vector<200x128xf32>, vector<1x128xf32> -> vector<1x128xf32>
    %76 = arith.addf %74, %75 : vector<1x128xf32>
    %c0_38 = arith.constant 0 : index
    %c0_39 = arith.constant 0 : index
    %77 = vector.load %arg15[%c0_38, %c0_39] : memref<1x128xf32, #tpu.memory_space<vmem>>, vector<1x128xf32>
    tpu.vector_store %arg15[%c0_38, %c0_39], %76 {strides = array<i32>} : memref<1x128xf32, #tpu.memory_space<vmem>>, vector<1x128xf32>,
    %c0_40 = arith.constant 0 : index
    %c0_41 = arith.constant 0 : index
    %78 = vector.load %arg13[%c0_40, %c0_41] : memref<1x1xf32, #tpu.memory_space<vmem>>, vector<1x1xf32>
    tpu.vector_store %arg13[%c0_40, %c0_41], %58 {strides = array<i32>} : memref<1x1xf32, #tpu.memory_space<vmem>>, vector<1x1xf32>,
    %c0_i32_42 = arith.constant 0 : i32
    %79 = arith.cmpi eq, %arg1, %c0_i32_42 : i32
    %80 = arith.extui %79 : i1 to i32
    %c0_i32_43 = arith.constant 0 : i32
    %81 = arith.cmpi ne, %80, %c0_i32_43 : i32
    scf.if %81 {
      %c0_44 = arith.constant 0 : index
      %c0_45 = arith.constant 0 : index
      %82 = vector.load %arg13[%c0_44, %c0_45] : memref<1x1xf32, #tpu.memory_space<vmem>>, vector<1x1xf32>
      %83 = vector.shape_cast %82 : vector<1x1xf32> to vector<1x1x1xf32>
      %84 = vector.broadcast %83 : vector<1x1x1xf32> to vector<1x1x128xf32>
      %c0_46 = arith.constant 0 : index
      %c0_47 = arith.constant 0 : index
      %c0_48 = arith.constant 0 : index
      %85 = vector.load %arg10[%c0_46, %c0_47, %c0_48] : memref<1x1x128xf32, #tpu.memory_space<vmem>>, vector<1x1x128xf32>
      tpu.vector_store %arg10[%c0_46, %c0_47, %c0_48], %84 {strides = array<i32>} : memref<1x1x128xf32, #tpu.memory_space<vmem>>, vector<1x1x128xf32>,
      %c0_49 = arith.constant 0 : index
      %c0_50 = arith.constant 0 : index
      %86 = vector.load %arg14[%c0_49, %c0_50] : memref<1x1xf32, #tpu.memory_space<vmem>>, vector<1x1xf32>
      %87 = vector.shape_cast %86 : vector<1x1xf32> to vector<1x1x1xf32>
      %88 = vector.broadcast %87 : vector<1x1x1xf32> to vector<1x1x128xf32>
      %c0_51 = arith.constant 0 : index
      %c0_52 = arith.constant 0 : index
      %c0_53 = arith.constant 0 : index
      %89 = vector.load %arg11[%c0_51, %c0_52, %c0_53] : memref<1x1x128xf32, #tpu.memory_space<vmem>>, vector<1x1x128xf32>
      tpu.vector_store %arg11[%c0_51, %c0_52, %c0_53], %88 {strides = array<i32>} : memref<1x1x128xf32, #tpu.memory_space<vmem>>, vector<1x1x128xf32>,
      %c0_54 = arith.constant 0 : index
      %c0_55 = arith.constant 0 : index
      %90 = vector.load %arg15[%c0_54, %c0_55] : memref<1x128xf32, #tpu.memory_space<vmem>>, vector<1x128xf32>
      %91 = vector.shape_cast %90 : vector<1x128xf32> to vector<1x1x128xf32>
      %c0_56 = arith.constant 0 : index
      %c0_57 = arith.constant 0 : index
      %c0_58 = arith.constant 0 : index
      %92 = vector.load %arg12[%c0_56, %c0_57, %c0_58] : memref<1x1x128xf32, #tpu.memory_space<vmem>>, vector<1x1x128xf32>
      tpu.vector_store %arg12[%c0_56, %c0_57, %c0_58], %91 {strides = array<i32>} : memref<1x1x128xf32, #tpu.memory_space<vmem>>, vector<1x1x128xf32>,
    } else {
    }
    return
  }
  func.func @transform_0(%arg0: i32, %arg1: i32) -> (i32, i32) {
    %c1_i32 = arith.constant 1 : i32
    %0 = arith.muli %arg1, %c1_i32 : i32
    %1 = arith.addi %0, %arg0 : i32
    %c0_i32 = arith.constant 0 : i32
    %2 = arith.minsi %1, %c0_i32 : i32
    %c0_i32_0 = arith.constant 0 : i32
    %c0_i32_1 = arith.constant 0 : i32
    return %2, %c0_i32_0 : i32, i32
  }
  func.func @transform_1(%arg0: i32, %arg1: i32) -> (i32, i32) {
    %c0_i32 = arith.constant 0 : i32
    %c0_i32_0 = arith.constant 0 : i32
    %c0_i32_1 = arith.constant 0 : i32
    return %c0_i32, %c0_i32_0 : i32, i32
  }
  func.func @transform_2(%arg0: i32, %arg1: i32) -> (i32, i32) {
    %c0_i32 = arith.constant 0 : i32
    %c0_i32_0 = arith.constant 0 : i32
    %c0_i32_1 = arith.constant 0 : i32
    return %c0_i32, %c0_i32_0 : i32, i32
  }
  func.func @transform_3(%arg0: i32, %arg1: i32) -> (i32, i32) {
    %c0_i32 = arith.constant 0 : i32
    %c0_i32_0 = arith.constant 0 : i32
    %c0_i32_1 = arith.constant 0 : i32
    return %c0_i32, %c0_i32_0 : i32, i32
  }
  func.func @transform_4(%arg0: i32, %arg1: i32) -> (i32, i32) {
    %c0_i32 = arith.constant 0 : i32
    %c0_i32_0 = arith.constant 0 : i32
    %c0_i32_1 = arith.constant 0 : i32
    return %c0_i32, %c0_i32_0 : i32, i32
  }
  func.func @transform_5(%arg0: i32, %arg1: i32) -> (i32, i32) {
    %c0_i32 = arith.constant 0 : i32
    %c0_i32_0 = arith.constant 0 : i32
    %c0_i32_1 = arith.constant 0 : i32
    return %c0_i32, %c0_i32_0 : i32, i32
  }
  func.func @transform_6(%arg0: i32, %arg1: i32) -> (i32, i32) {
    %c0_i32 = arith.constant 0 : i32
    %c0_i32_0 = arith.constant 0 : i32
    %c0_i32_1 = arith.constant 0 : i32
    return %c0_i32, %c0_i32_0 : i32, i32
  }
  func.func @transform_7(%arg0: i32, %arg1: i32) -> (i32, i32) {
    %c1_i32 = arith.constant 1 : i32
    %0 = arith.muli %arg1, %c1_i32 : i32
    %1 = arith.addi %0, %arg0 : i32
    %c0_i32 = arith.constant 0 : i32
    %c0_i32_0 = arith.constant 0 : i32
    return %c0_i32, %1 : i32, i32
  }
  func.func @transform_8(%arg0: i32, %arg1: i32) -> (i32, i32, i32) {
    %c0_i32 = arith.constant 0 : i32
    %c0_i32_0 = arith.constant 0 : i32
    %c0_i32_1 = arith.constant 0 : i32
    return %arg0, %c0_i32, %c0_i32_0 : i32, i32, i32
  }
  func.func @transform_9(%arg0: i32, %arg1: i32) -> (i32, i32, i32) {
    %c0_i32 = arith.constant 0 : i32
    %c0_i32_0 = arith.constant 0 : i32
    %c0_i32_1 = arith.constant 0 : i32
    return %arg0, %c0_i32, %c0_i32_0 : i32, i32, i32
  }
  func.func @transform_10(%arg0: i32, %arg1: i32) -> (i32, i32, i32) {
    %c0_i32 = arith.constant 0 : i32
    %c0_i32_0 = arith.constant 0 : i32
    %c0_i32_1 = arith.constant 0 : i32
    return %arg0, %c0_i32, %c0_i32_0 : i32, i32, i32
  }
}

</mosaic_0001>

<bundles_post_ra>
// kernel: clam_sb_pallas.1
= control target key start
LH: loop header
LB: loop body
LE: loop exit
PB: predicated region body
PF: predicated region fallthrough
CT: control target
= control target key end

     0   :  { %s2701_s0 = inlined_call_operand.vmem [shape: f32[200,256], index: 0, kind: input, shape index: {}]   ;;  %s2702_s1 = inlined_call_operand.vmem [shape: bf16[256,128], index: 1, kind: input, shape index: {}]   ;;  %s2703_s2 = inlined_call_operand.vmem [shape: f32[1,128], index: 2, kind: input, shape index: {}]   ;;  %s2704_s3 = inlined_call_operand.vmem [shape: bf16[128,512], index: 3, kind: input, shape index: {}]   ;;  %s2705_s4 = inlined_call_operand.vmem [shape: f32[1,512], index: 4, kind: input, shape index: {}]   ;;  %s2706_s5 = inlined_call_operand.vmem [shape: bf16[1,256], index: 5, kind: input, shape index: {}]   ;;  %s2707_s6 = inlined_call_operand.<no memory space> [shape: f32[1,1], index: 6, kind: input, shape index: {}]   ;;  %s2708_s7 = inlined_call_operand.hbm [shape: f32[1,200], index: 7, kind: output, shape index: {0}]   ;;  %s2709_s8 = inlined_call_operand.vmem [shape: f32[1,1,128], index: 8, kind: output, shape index: {1}]   ;;  %s2710_s9 = inlined_call_operand.vmem [shape: f32[1,1,128], index: 9, kind: output, shape index: {2}]   ;;  %s2711_s10 = inlined_call_operand.vmem [shape: f32[1,1,128], index: 10, kind: output, shape index: {3}]  }
   0x1   :  { %v16_v0 = vstv %s2707_s6 }
   0x2   :  { %17 = vst [vmem:[#allocation5] sm:$0x1] %v16_v0 }
   0x3   :  { %v1852_v1 = vld [vmem:[%s2702_s1 + $0x40] sm:$0xff]   ;;  %v1854_v3 = vld [vmem:[%s2702_s1 + $0x48] sm:$0xff]   ;;  %v1856_v5 = vld [vmem:[%s2702_s1 + $0x50] sm:$0xff]  }
   0x4   :  { %v1853_v2 = vld [vmem:[%s2702_s1] sm:$0xff]   ;;  %1714 = vmatprep.subr.bf16.mxu0 %v1852_v1  ;;  %v1855_v4 = vld [vmem:[%s2702_s1 + $0x8] sm:$0xff]   ;;  %v1857_v6 = vld [vmem:[%s2702_s1 + $0x10] sm:$0xff]  }
   0x5   :  { %1715 = vmatpush3.bf16.msra.mxu0 %v1853_v2  ;;  %v1858_v7 = vld [vmem:[%s2702_s1 + $0x58] sm:$0xff]   ;;  %v1860_v9 = vld [vmem:[%s2702_s1 + $0x60] sm:$0xff]   ;;  %v1862_v11 = vld [vmem:[%s2702_s1 + $0x68] sm:$0xff]  }
   0x6   :  { %1716 = vmatprep.subr.bf16.mxu0 %v1854_v3  ;;  %v1859_v8 = vld [vmem:[%s2702_s1 + $0x18] sm:$0xff]   ;;  %v1861_v10 = vld [vmem:[%s2702_s1 + $0x20] sm:$0xff]   ;;  %v84_v12 = vld [vmem:[%s2701_s0 + $0x8] sm:$0xff] }
   0x7   :  { %v86_v13 = vld [vmem:[%s2701_s0 + $0x18] sm:$0xff]  ;;  %v1863_v15 = vld [vmem:[%s2702_s1 + $0x28] sm:$0xff]   ;;  %v1864_v16 = vld [vmem:[%s2702_s1 + $0x70] sm:$0xff]  }
   0x8   :  { %v134_v14 = vpack.c.bf16 %v86_v13, %v84_v12  ;;  %v1865_v17 = vld [vmem:[%s2702_s1 + $0x30] sm:$0xff]   ;;  %v1866_v18 = vld [vmem:[%s2702_s1 + $0x78] sm:$0xff]   ;;  %v83_v20 = vld [vmem:[%s2701_s0] sm:$0xff] }
   0x9   :  { %1717 = vmatpush3.bf16.msra.mxu0 %v1855_v4  ;;  %v1867_v19 = vld [vmem:[%s2702_s1 + $0x38] sm:$0xff]   ;;  %v85_v21 = vld [vmem:[%s2701_s0 + $0x10] sm:$0xff]  ;;  %v88_v22 = vld [vmem:[%s2701_s0 + $0x28] sm:$0xff] }
   0xa   :  { %1718 = vmatprep.subr.bf16.mxu0 %v1856_v5  ;;  %326 = vmatprep.mubr.bf16.mxu0 %v134_v14  ;;  %v90_v23 = vld [vmem:[%s2701_s0 + $0x38] sm:$0xff]  ;;  %v133_v24 = vpack.c.bf16 %v85_v21, %v83_v20  ;;  %v87_v26 = vld [vmem:[%s2701_s0 + $0x20] sm:$0xff]  ;;  %v89_v27 = vld [vmem:[%s2701_s0 + $0x30] sm:$0xff] }
   0xb   :  { %v136_v25 = vpack.c.bf16 %v90_v23, %v88_v22  ;;  %v1868_v28 = vld [vmem:[%s2704_s3 + $0x8] ss:$16 sps:$4 sm:$0xff]   ;;  %v1870_v29 = vld [vmem:[%s2704_s3 + $0xc] ss:$16 sps:$4 sm:$0xff]   ;;  %v135_v35 = vpack.c.bf16 %v89_v27, %v87_v26  ;;  %v91_v39 = vld [vmem:[%s2701_s0 + $0x40] sm:$0xff] }
   0xc   :  { %v92_v30 = vld [vmem:[%s2701_s0 + $0x48] sm:$0xff]  ;;  %v94_v32 = vld [vmem:[%s2701_s0 + $0x58] sm:$0xff]  ;;  %v93_v40 = vld [vmem:[%s2701_s0 + $0x50] sm:$0xff] }
   0xd   :  { %1719 = vmatpush3.bf16.msra.mxu0 %v1857_v6  ;;  %v1873_v31 = vld [vmem:[%s2704_s3 + $0x2c] ss:$16 sps:$4 sm:$0xff]   ;;  %v1871_v33 = vld [vmem:[%s2704_s3 + $0x28] ss:$16 sps:$4 sm:$0xff]   ;;  %v138_v36 = vpack.c.bf16 %v94_v32, %v92_v30  ;;  %v1886_v41 = vld [vmem:[%s2704_s3 + $0x4] ss:$16 sps:$4 sm:$0xff]   ;;  %v137_v50 = vpack.c.bf16 %v93_v40, %v91_v39 }
   0xe   :  { %1720 = vmatprep.subr.bf16.mxu0 %v1858_v7  ;;  %v1876_v34 = vld [vmem:[%s2704_s3 + $0x4c] ss:$16 sps:$4 sm:$0xff]   ;;  %v1874_v37 = vld [vmem:[%s2704_s3 + $0x48] ss:$16 sps:$4 sm:$0xff]   ;;  %v1888_v42 = vld [vmem:[%s2704_s3] ss:$16 sps:$4 sm:$0xff]   ;;  %834 = vmatprep.subr.bf16.mxu1 %v1886_v41 }
   0xf   :  { %v1879_v38 = vld [vmem:[%s2704_s3 + $0x6c] ss:$16 sps:$4 sm:$0xff]   ;;  %v1889_v44 = vld [vmem:[%s2704_s3 + $0x24] ss:$16 sps:$4 sm:$0xff]   ;;  %v1877_v46 = vld [vmem:[%s2704_s3 + $0x68] ss:$16 sps:$4 sm:$0xff]   ;;  %835 = vmatpush1.bf16.msra.mxu1 %v1888_v42 }
  0x10   :  { %v96_v43 = vld [vmem:[%s2701_s0 + $0x68] sm:$0xff]  ;;  %v98_v45 = vld [vmem:[%s2701_s0 + $0x78] sm:$0xff]  ;;  %v1891_v47 = vld [vmem:[%s2704_s3 + $0x20] ss:$16 sps:$4 sm:$0xff]   ;;  %836 = vmatprep.subr.bf16.mxu1 %v1889_v44 }
  0x11   :  { %1721 = vmatpush3.bf16.msra.mxu0 %v1859_v8  ;;  %v1882_v48 = vld [vmem:[%s2704_s3 + $0x8c] ss:$16 sps:$4 sm:$0xff]   ;;  %v1895_v49 = vld [vmem:[%s2704_s3 + $0x44] ss:$16 sps:$4 sm:$0xff]   ;;  %v140_v51 = vpack.c.bf16 %v98_v45, %v96_v43  ;;  %v1880_v52 = vld [vmem:[%s2704_s3 + $0x88] ss:$16 sps:$4 sm:$0xff]  }
  0x12   :  { %1722 = vmatprep.subr.bf16.mxu0 %v1860_v9  ;;  %v1897_v53 = vld [vmem:[%s2704_s3 + $0x40] ss:$16 sps:$4 sm:$0xff]   ;;  %v1885_v56 = vld [vmem:[%s2704_s3 + $0xac] ss:$16 sps:$4 sm:$0xff]   ;;  %v1898_v57 = vld [vmem:[%s2704_s3 + $0x64] ss:$16 sps:$4 sm:$0xff]  }
  0x13   :  { %837 = vmatpush1.bf16.msra.mxu1 %v1891_v47  ;;  %v95_v54 = vld [vmem:[%s2701_s0 + $0x60] sm:$0xff]  ;;  %v97_v55 = vld [vmem:[%s2701_s0 + $0x70] sm:$0xff]  ;;  %v100_v58 = vld [vmem:[%s2701_s0 + $0x88] sm:$0xff] }
  0x14   :  { %838 = vmatprep.subr.bf16.mxu1 %v1895_v49  ;;  %v102_v59 = vld [vmem:[%s2701_s0 + $0x98] sm:$0xff]  ;;  %v1900_v61 = vld [vmem:[%s2704_s3 + $0x60] ss:$16 sps:$4 sm:$0xff]  }
  0x15   :  { %1723 = vmatpush3.bf16.msra.mxu0 %v1861_v10  ;;  %v1883_v60 = vld [vmem:[%s2704_s3 + $0xa8] ss:$16 sps:$4 sm:$0xff]  }
  0x16   :  { %1724 = vmatprep.subr.bf16.mxu0 %v1862_v11 }
  0x17   :  { %839 = vmatpush1.bf16.msra.mxu1 %v1897_v53 }
  0x19   :  { %1725 = vmatpush3.bf16.msra.mxu0 %v1863_v15 }
  0x1a   :  { %1726 = vmatprep.subr.bf16.mxu0 %v1864_v16 }
  0x1d   :  { %1727 = vmatpush3.bf16.msra.mxu0 %v1865_v17 }
  0x1e   :  { %1728 = vmatprep.subr.bf16.mxu0 %v1866_v18 }
  0x21   :  { %1729 = vmatpush3.bf16.msra.mxu0 %v1867_v19 }
  0x22   :  { %995 = vmatprep.subr.bf16.mxu0 %v1870_v29 }
  0x24   :  { %327 = vmatmul.mubr.bf16.vlgmr.msra.gmra.mrb[0].mxu0 %v133_v24 }
  0x25   :  { %334 = vmatprep.mubr.bf16.mxu0 %v136_v25  ;;  %996 = vmatpush1.bf16.msra.mxu0 %v1868_v28 }
  0x26   :  { %997 = vmatprep.subr.bf16.mxu0 %v1873_v31 }
  0x29   :  { %998 = vmatpush1.bf16.msra.mxu0 %v1871_v33 }
  0x2a   :  { %999 = vmatprep.subr.bf16.mxu0 %v1876_v34 }
  0x2c   :  { %335 = vmatmul.mubr.bf16.gmra.mrb[4].mxu0 %v135_v35 }
  0x2d   :  { %342 = vmatprep.mubr.bf16.mxu0 %v138_v36  ;;  %1000 = vmatpush1.bf16.msra.mxu0 %v1874_v37 }
  0x2e   :  { %1001 = vmatprep.subr.bf16.mxu0 %v1879_v38 }
  0x31   :  { %1002 = vmatpush1.bf16.msra.mxu0 %v1877_v46 }
  0x32   :  { %1003 = vmatprep.subr.bf16.mxu0 %v1882_v48 }
  0x34   :  { %343 = vmatmul.mubr.bf16.gmra.mrb[8].mxu0 %v137_v50 }
  0x35   :  { %350 = vmatprep.mubr.bf16.mxu0 %v140_v51  ;;  %1004 = vmatpush1.bf16.msra.mxu0 %v1880_v52 }
  0x36   :  { %18 = vsyncpa [#allocation7], 0  ;;  %1005 = vmatprep.subr.bf16.mxu0 %v1885_v56  ;;  %v1894_v62 = vld [vmem:[%s2704_s3 + $0xcc] ss:$16 sps:$4 sm:$0xff]   ;;  %840 = vmatprep.subr.bf16.mxu1 %v1898_v57  ;;  %v1901_v63 = vld [vmem:[%s2704_s3 + $0x84] ss:$16 sps:$4 sm:$0xff]   ;;  %v139_v0 = vpack.c.bf16 %v97_v55, %v95_v54  ;;  %v142_v1 = vpack.c.bf16 %v102_v59, %v100_v58 }
  0x37   :  { %v1892_v2 = vld [vmem:[%s2704_s3 + $0xc8] ss:$16 sps:$4 sm:$0xff]   ;;  %841 = vmatpush1.bf16.msra.mxu1 %v1900_v61  ;;  %v1903_v3 = vld [vmem:[%s2704_s3 + $0x80] ss:$16 sps:$4 sm:$0xff]   ;;  %v1906_v4 = vld [vmem:[%s2704_s3 + $0xec] ss:$16 sps:$4 sm:$0xff]  }
  0x38   :  { %842 = vmatprep.subr.bf16.mxu1 %v1901_v63  ;;  %v99_v5 = vld [vmem:[%s2701_s0 + $0x80] sm:$0xff]  ;;  %v101_v6 = vld [vmem:[%s2701_s0 + $0x90] sm:$0xff]  ;;  %v104_v7 = vld [vmem:[%s2701_s0 + $0xa8] sm:$0xff]  ;;  %v2050_v61 = vmov 0   ;;  %vm79_vm0 = vcmask 0   ;;  %vm1474_vm2 = vcmask 1040384  }
  0x39   :  { %1006 = vmatpush1.bf16.msra.mxu0 %v1883_v60  ;;  %v106_v8 = vld [vmem:[%s2701_s0 + $0xb8] sm:$0xff]  ;;  %v141_v10 = vpack.c.bf16 %v101_v6, %v99_v5  ;;  %v103_v12 = vld [vmem:[%s2701_s0 + $0xa0] sm:$0xff]  ;;  %v105_v13 = vld [vmem:[%s2701_s0 + $0xb0] sm:$0xff]  ;;  %866 = vmatprep.mubr.bf16.mxu1 %v2050_v61  ;;  %vm1476_vm3 = vcmask 581632   ;;  %vm1523_vm5 = vcmask 588800   ;;  %s2055_s17 = smov [#allocation6]  }
  0x3a   :  { %1007 = vmatprep.subr.bf16.mxu0 %v1894_v62  ;;  %v1904_v9 = vld [vmem:[%s2704_s3 + $0xe8] ss:$16 sps:$4 sm:$0xff]   ;;  %v144_v11 = vpack.c.bf16 %v106_v8, %v104_v7  ;;  %v143_v16 = vpack.c.bf16 %v105_v13, %v103_v12  ;;  %v107_v18 = vld [vmem:[%s2701_s0 + $0xc0] sm:$0xff]  ;;  %v109_v19 = vld [vmem:[%s2701_s0 + $0xd0] sm:$0xff]  ;;  %1850 = vset.pattern.permute.xlu0 %v2050_v61  ;;  %s1637_s18 = sshll.u32 %s2055_s17, 4  ;;  %s1638_s18 = int_to_ptr.vmem [resolvable:$true] %s1637_s18 }
  0x3b   :  { %843 = vmatpush1.bf16.msra.mxu1 %v1903_v3  ;;  %v108_v14 = vld [vmem:[%s2701_s0 + $0xc8] sm:$0xff]  ;;  %v110_v15 = vld [vmem:[%s2701_s0 + $0xd8] sm:$0xff]  ;;  %v145_v22 = vpack.c.bf16 %v109_v19, %v107_v18  ;;  %v111_v24 = vld [vmem:[%s2701_s0 + $0xe0] sm:$0xff]  ;;  %1851 = vset.pattern.permute.xlu1 %v2050_v61  ;;  %s2026_s19 = scalar_lea.vmem %s1638_s18, 32  ;;  %p2031_p1 = scmp.lt.s32.totalorder %s1638_s18, %s1638_s18 }
  0x3c   :  { %351 = vmatmul.mubr.bf16.gmra.mrb[12].mxu0 %v139_v0  ;;  %v146_v17 = vpack.c.bf16 %v110_v15, %v108_v14  ;;  %v112_v20 = vld [vmem:[%s2701_s0 + $0xe8] sm:$0xff]  ;;  %v114_v21 = vld [vmem:[%s2701_s0 + $0xf8] sm:$0xff]  ;;  %v113_v25 = vld [vmem:[%s2701_s0 + $0xf0] sm:$0xff]  ;;  %p2027_p0 = scmp.ne.s32.totalorder %s1638_s18, %s2026_s19  ;;  %p2032_p2 = scmp.lt.s32.totalorder %s2026_s19, %s2026_s19 }
  0x3d   :  { %358 = vmatprep.mubr.bf16.mxu0 %v142_v1  ;;  %1008 = vmatpush1.bf16.msra.mxu0 %v1892_v2  ;;  %v148_v23 = vpack.c.bf16 %v114_v21, %v112_v20  ;;  %v116_v26 = vld [vmem:[%s2701_s0 + $0x108] sm:$0xff]  ;;  %v118_v27 = vld [vmem:[%s2701_s0 + $0x118] sm:$0xff]  ;;  %v147_v28 = vpack.c.bf16 %v113_v25, %v111_v24  ;;  %v115_v30 = vld [vmem:[%s2701_s0 + $0x100] sm:$0xff] }
  0x3e   :  { %1009 = vmatprep.subr.bf16.mxu0 %v1906_v4  ;;  %v150_v29 = vpack.c.bf16 %v118_v27, %v116_v26  ;;  %v117_v31 = vld [vmem:[%s2701_s0 + $0x110] sm:$0xff]  ;;  %v120_v32 = vld [vmem:[%s2701_s0 + $0x128] sm:$0xff]  ;;  %v122_v33 = vld [vmem:[%s2701_s0 + $0x138] sm:$0xff]  ;;  %p2033_p3 = por %p2032_p2, %p2031_p1 }
  0x3f   :  { %v149_v34 = vpack.c.bf16 %v117_v31, %v115_v30  ;;  %v152_v35 = vpack.c.bf16 %v122_v33, %v120_v32  ;;  %v119_v36 = vld [vmem:[%s2701_s0 + $0x120] sm:$0xff]  ;;  %v121_v37 = vld [vmem:[%s2701_s0 + $0x130] sm:$0xff]  ;;  %v124_v38 = vld [vmem:[%s2701_s0 + $0x148] sm:$0xff] }
  0x40   :  { %v126_v39 = vld [vmem:[%s2701_s0 + $0x158] sm:$0xff]  ;;  %v151_v40 = vpack.c.bf16 %v121_v37, %v119_v36  ;;  %v123_v42 = vld [vmem:[%s2701_s0 + $0x140] sm:$0xff]  ;;  %v125_v43 = vld [vmem:[%s2701_s0 + $0x150] sm:$0xff]  ;;  %p2034_p4 = pnand %p2033_p3, %p2027_p0 }
  0x41   :  { %1010 = vmatpush1.bf16.msra.mxu0 %v1904_v9  ;;  %v154_v41 = vpack.c.bf16 %v126_v39, %v124_v38  ;;  %v128_v44 = vld [vmem:[%s2701_s0 + $0x168] sm:$0xff]  ;;  %v130_v45 = vld [vmem:[%s2701_s0 + $0x178] sm:$0xff]  ;;  %v153_v46 = vpack.c.bf16 %v125_v43, %v123_v42  ;;  %v127_v48 = vld [vmem:[%s2701_s0 + $0x160] sm:$0xff] }
  0x42   :  { %v156_v47 = vpack.c.bf16 %v130_v45, %v128_v44  ;;  %v129_v49 = vld [vmem:[%s2701_s0 + $0x170] sm:$0xff]  ;;  %v132_v51 = vld [vmem:[%s2701_s0 + $0x188] sm:$0xff]  ;;  %v131_v57 = vld [vmem:[%s2701_s0 + $0x180] sm:$0xff] }
  0x43   :  { %v1907_v50 = vld [vmem:[%s2704_s3 + $0xa4] ss:$16 sps:$4 sm:$0xff]   ;;  %v1909_v52 = vld [vmem:[%s2704_s3 + $0xa0] ss:$16 sps:$4 sm:$0xff]   ;;  %v155_v53 = vpack.c.bf16 %v129_v49, %v127_v48  ;;  %v158_v54 = vpack.c.bf16 %v132_v51, %v132_v51  ;;  %v157_v60 = vpack.c.bf16 %v131_v57, %v131_v57 }
  0x44   :  { %359 = vmatmul.mubr.bf16.gmra.mrb[16].mxu0 %v141_v10  ;;  %844 = vmatprep.subr.bf16.mxu1 %v1907_v50  ;;  %v1910_v55 = vld [vmem:[%s2704_s3 + $0xc4] ss:$16 sps:$4 sm:$0xff]   ;;  %v1912_v56 = vld [vmem:[%s2704_s3 + $0xc0] ss:$16 sps:$4 sm:$0xff]  }
  0x45   :  { %366 = vmatprep.mubr.bf16.mxu0 %v144_v11  ;;  %845 = vmatpush1.bf16.msra.mxu1 %v1909_v52  ;;  %v1913_v58 = vld [vmem:[%s2704_s3 + $0xe4] ss:$16 sps:$4 sm:$0xff]   ;;  %v1915_v59 = vld [vmem:[%s2704_s3 + $0xe0] ss:$16 sps:$4 sm:$0xff]  }
  0x46   :  { %846 = vmatprep.subr.bf16.mxu1 %v1910_v55  ;;  %v2415_v63 = vld [vmem:[%s2703_s2] ss:$0 sm:$0xff] }
  0x49   :  { %847 = vmatpush1.bf16.msra.mxu1 %v1912_v56 }
  0x4a   :  { %848 = vmatprep.subr.bf16.mxu1 %v1913_v58 }
  0x4c   :  { %367 = vmatmul.mubr.bf16.gmra.mrb[20].mxu0 %v143_v16 }
  0x4d   :  { %374 = vmatprep.mubr.bf16.mxu0 %v146_v17  ;;  %849 = vmatpush1.bf16.msra.mxu1 %v1915_v59 }
  0x54   :  { %375 = vmatmul.mubr.bf16.gmra.mrb[24].mxu0 %v145_v22 }
  0x55   :  { %382 = vmatprep.mubr.bf16.mxu0 %v148_v23 }
  0x5c   :  { %383 = vmatmul.mubr.bf16.gmra.mrb[28].mxu0 %v147_v28 }
  0x5d   :  { %390 = vmatprep.mubr.bf16.mxu0 %v150_v29 }
  0x64   :  { %391 = vmatmul.mubr.bf16.gmra.mrb[32].mxu0 %v149_v34 }
  0x65   :  { %398 = vmatprep.mubr.bf16.mxu0 %v152_v35 }
  0x6c   :  { %399 = vmatmul.mubr.bf16.gmra.mrb[36].mxu0 %v151_v40 }
  0x6d   :  { %406 = vmatprep.mubr.bf16.mxu0 %v154_v41 }
  0x74   :  { %407 = vmatmul.mubr.bf16.gmra.mrb[40].mxu0 %v153_v46 }
  0x75   :  { %414 = vmatprep.mubr.bf16.mxu0 %v156_v47 }
  0x7c   :  { %415 = vmatmul.mubr.bf16.gmra.mrb[44].mxu0 %v155_v53 }
  0x7d   :  { %422 = vmatprep.mubr.bf16.mxu0 %v158_v54 }
  0x84   :  { %423 = vmatmul.mubr.bf16.gmra.mrb[48].mxu0 %v157_v60 }
  0x85   :  { %1027 = vmatprep.mubr.bf16.mxu0 %v2050_v61 }
  0xf7   :  { %v1730_v62 = vpop.f32.mrb[0].mxu0 }
  0xf8   :  { %v1731_v0 = vpop.f32.mrb[1].mxu0 }
  0xf9   :  { %v1732_v1 = vadd.f32 %v1731_v0, %v1730_v62  ;;  %v1733_v2 = vpop.f32.mrb[2].mxu0 }
  0xfa   :  { %v1734_v3 = vpop.f32.mrb[3].mxu0 }
  0xfb   :  { %v329_v4 = vadd.f32 %v1732_v1, %v2415_v63  ;;  %v1735_v5 = vadd.f32 %v1734_v3, %v1733_v2 }
  0xfd   :  { %v332_v6 = vadd.f32 %v1735_v5, %v2415_v63  ;;  %v430_v7 = vmax.f32 %v329_v4, 0.0 }
  0xff   :  { %v431_v8 = vmax.f32 %v332_v6, 0.0  ;;  %v1736_v9 = vpop.f32.mrb[4].mxu0 }
 0x100   :  { %v1737_v10 = vpop.f32.mrb[5].mxu0 }
 0x101   :  { %v1738_v11 = vadd.f32 %v1737_v10, %v1736_v9  ;;  %v1739_v12 = vpop.f32.mrb[6].mxu0  ;;  %v2419_v13 = vpack.c.bf16 %v431_v8, %v430_v7 }
 0x102   :  { %v1740_v14 = vpop.f32.mrb[7].mxu0 }
 0x103   :  { %v337_v15 = vadd.f32 %v1738_v11, %v2415_v63  ;;  %v1741_v16 = vadd.f32 %v1740_v14, %v1739_v12  ;;  %867 = vmatmul.mubr.bf16.vlgmr.msra.gmra.mrb[0].mxu1 %v2419_v13  ;;  %1028 = vmatmul.mubr.bf16.vlgmr.msra.gmra.mrb[52].mxu0 %v2419_v13 }
 0x104   :  { %876 = vmatprep.mubr.bf16.mxu1 %v2050_v61  ;;  %1037 = vmatprep.mubr.bf16.mxu0 %v2050_v61 }
 0x105   :  { %v340_v17 = vadd.f32 %v1741_v16, %v2415_v63  ;;  %v432_v18 = vmax.f32 %v337_v15, 0.0 }
 0x107   :  { %v433_v19 = vmax.f32 %v340_v17, 0.0  ;;  %v1742_v20 = vpop.f32.mrb[8].mxu0 }
 0x108   :  { %v1743_v21 = vpop.f32.mrb[9].mxu0 }
 0x109   :  { %v1744_v22 = vadd.f32 %v1743_v21, %v1742_v20  ;;  %v1745_v23 = vpop.f32.mrb[10].mxu0  ;;  %v2427_v24 = vpack.c.bf16 %v433_v19, %v432_v18 }
 0x10a   :  { %v1746_v25 = vpop.f32.mrb[11].mxu0 }
 0x10b   :  { %v345_v26 = vadd.f32 %v1744_v22, %v2415_v63  ;;  %v1747_v27 = vadd.f32 %v1746_v25, %v1745_v23  ;;  %877 = vmatmul.mubr.bf16.gmra.mrb[4].mxu1 %v2427_v24  ;;  %1038 = vmatmul.mubr.bf16.gmra.mrb[56].mxu0 %v2427_v24 }
 0x10c   :  { %886 = vmatprep.mubr.bf16.mxu1 %v2050_v61  ;;  %1047 = vmatprep.mubr.bf16.mxu0 %v2050_v61 }
 0x10d   :  { %v348_v28 = vadd.f32 %v1747_v27, %v2415_v63  ;;  %v434_v29 = vmax.f32 %v345_v26, 0.0 }
 0x10f   :  { %v435_v30 = vmax.f32 %v348_v28, 0.0  ;;  %v1748_v31 = vpop.f32.mrb[12].mxu0 }
 0x110   :  { %v1749_v32 = vpop.f32.mrb[13].mxu0 }
 0x111   :  { %v1750_v33 = vadd.f32 %v1749_v32, %v1748_v31  ;;  %v1751_v34 = vpop.f32.mrb[14].mxu0  ;;  %v2435_v35 = vpack.c.bf16 %v435_v30, %v434_v29 }
 0x112   :  { %v1752_v36 = vpop.f32.mrb[15].mxu0 }
 0x113   :  { %v353_v37 = vadd.f32 %v1750_v33, %v2415_v63  ;;  %v1753_v38 = vadd.f32 %v1752_v36, %v1751_v34  ;;  %887 = vmatmul.mubr.bf16.gmra.mrb[8].mxu1 %v2435_v35  ;;  %1048 = vmatmul.mubr.bf16.gmra.mrb[60].mxu0 %v2435_v35 }
 0x114   :  { %896 = vmatprep.mubr.bf16.mxu1 %v2050_v61  ;;  %1057 = vmatprep.mubr.bf16.mxu0 %v2050_v61 }
 0x115   :  { %v356_v39 = vadd.f32 %v1753_v38, %v2415_v63  ;;  %v436_v40 = vmax.f32 %v353_v37, 0.0 }
 0x117   :  { %v437_v41 = vmax.f32 %v356_v39, 0.0  ;;  %v1754_v42 = vpop.f32.mrb[16].mxu0 }
 0x118   :  { %v1755_v43 = vpop.f32.mrb[17].mxu0 }
 0x119   :  { %v1756_v44 = vadd.f32 %v1755_v43, %v1754_v42  ;;  %v1757_v45 = vpop.f32.mrb[18].mxu0  ;;  %v2443_v46 = vpack.c.bf16 %v437_v41, %v436_v40 }
 0x11a   :  { %v1758_v47 = vpop.f32.mrb[19].mxu0 }
 0x11b   :  { %v361_v48 = vadd.f32 %v1756_v44, %v2415_v63  ;;  %v1759_v49 = vadd.f32 %v1758_v47, %v1757_v45  ;;  %897 = vmatmul.mubr.bf16.gmra.mrb[12].mxu1 %v2443_v46  ;;  %1058 = vmatmul.mubr.bf16.gmra.mrb[64].mxu0 %v2443_v46 }
 0x11c   :  { %906 = vmatprep.mubr.bf16.mxu1 %v2050_v61  ;;  %1067 = vmatprep.mubr.bf16.mxu0 %v2050_v61 }
 0x11d   :  { %v364_v50 = vadd.f32 %v1759_v49, %v2415_v63  ;;  %v438_v51 = vmax.f32 %v361_v48, 0.0 }
 0x11f   :  { %v439_v52 = vmax.f32 %v364_v50, 0.0  ;;  %v1760_v53 = vpop.f32.mrb[20].mxu0 }
 0x120   :  { %v1761_v54 = vpop.f32.mrb[21].mxu0 }
 0x121   :  { %v1762_v55 = vadd.f32 %v1761_v54, %v1760_v53  ;;  %v1763_v56 = vpop.f32.mrb[22].mxu0  ;;  %v2451_v57 = vpack.c.bf16 %v439_v52, %v438_v51 }
 0x122   :  { %v1764_v58 = vpop.f32.mrb[23].mxu0 }
 0x123   :  { %v369_v59 = vadd.f32 %v1762_v55, %v2415_v63  ;;  %v1765_v60 = vadd.f32 %v1764_v58, %v1763_v56  ;;  %907 = vmatmul.mubr.bf16.gmra.mrb[16].mxu1 %v2451_v57  ;;  %1068 = vmatmul.mubr.bf16.gmra.mrb[68].mxu0 %v2451_v57 }
 0x124   :  { %916 = vmatprep.mubr.bf16.mxu1 %v2050_v61  ;;  %1077 = vmatprep.mubr.bf16.mxu0 %v2050_v61 }
 0x125   :  { %v372_v62 = vadd.f32 %v1765_v60, %v2415_v63  ;;  %v440_v0 = vmax.f32 %v369_v59, 0.0 }
 0x127   :  { %v441_v1 = vmax.f32 %v372_v62, 0.0  ;;  %v1766_v2 = vpop.f32.mrb[24].mxu0 }
 0x128   :  { %v1767_v3 = vpop.f32.mrb[25].mxu0 }
 0x129   :  { %v1768_v4 = vadd.f32 %v1767_v3, %v1766_v2  ;;  %v1769_v5 = vpop.f32.mrb[26].mxu0  ;;  %v2459_v6 = vpack.c.bf16 %v441_v1, %v440_v0 }
 0x12a   :  { %v1770_v7 = vpop.f32.mrb[27].mxu0 }
 0x12b   :  { %v377_v8 = vadd.f32 %v1768_v4, %v2415_v63  ;;  %v1771_v9 = vadd.f32 %v1770_v7, %v1769_v5  ;;  %917 = vmatmul.mubr.bf16.gmra.mrb[20].mxu1 %v2459_v6  ;;  %1078 = vmatmul.mubr.bf16.gmra.mrb[72].mxu0 %v2459_v6 }
 0x12c   :  { %926 = vmatprep.mubr.bf16.mxu1 %v2050_v61  ;;  %1087 = vmatprep.mubr.bf16.mxu0 %v2050_v61 }
 0x12d   :  { %v380_v10 = vadd.f32 %v1771_v9, %v2415_v63  ;;  %v442_v11 = vmax.f32 %v377_v8, 0.0 }
 0x12f   :  { %v443_v12 = vmax.f32 %v380_v10, 0.0  ;;  %v1772_v14 = vpop.f32.mrb[28].mxu0 }
 0x130   :  { %v1773_v15 = vpop.f32.mrb[29].mxu0 }
 0x131   :  { %v1774_v16 = vadd.f32 %v1773_v15, %v1772_v14  ;;  %v1775_v17 = vpop.f32.mrb[30].mxu0  ;;  %v2467_v18 = vpack.c.bf16 %v443_v12, %v442_v11 }
 0x132   :  { %v1776_v19 = vpop.f32.mrb[31].mxu0 }
 0x133   :  { %v385_v20 = vadd.f32 %v1774_v16, %v2415_v63  ;;  %v1777_v21 = vadd.f32 %v1776_v19, %v1775_v17  ;;  %927 = vmatmul.mubr.bf16.gmra.mrb[24].mxu1 %v2467_v18  ;;  %1088 = vmatmul.mubr.bf16.gmra.mrb[76].mxu0 %v2467_v18 }
 0x134   :  { %936 = vmatprep.mubr.bf16.mxu1 %v2050_v61  ;;  %1097 = vmatprep.mubr.bf16.mxu0 %v2050_v61 }
 0x135   :  { %v388_v22 = vadd.f32 %v1777_v21, %v2415_v63  ;;  %v444_v23 = vmax.f32 %v385_v20, 0.0 }
 0x137   :  { %v445_v25 = vmax.f32 %v388_v22, 0.0  ;;  %v1778_v26 = vpop.f32.mrb[32].mxu0 }
 0x138   :  { %v1779_v27 = vpop.f32.mrb[33].mxu0 }
 0x139   :  { %v1780_v28 = vadd.f32 %v1779_v27, %v1778_v26  ;;  %v1781_v29 = vpop.f32.mrb[34].mxu0  ;;  %v2475_v30 = vpack.c.bf16 %v445_v25, %v444_v23  ;;  %v654_v23 = vlaneseq  ;;  %v2051_v27 = vmov 1966171168  }
 0x13a   :  { %v1782_v31 = vpop.f32.mrb[35].mxu0 }
 0x13b   :  { %v393_v32 = vadd.f32 %v1780_v28, %v2415_v63  ;;  %v1783_v33 = vadd.f32 %v1782_v31, %v1781_v29  ;;  %937 = vmatmul.mubr.bf16.gmra.mrb[28].mxu1 %v2475_v30  ;;  %1098 = vmatmul.mubr.bf16.gmra.mrb[80].mxu0 %v2475_v30  ;;  %v655_v25 = vshrl.u32 %v654_v23, 7  ;;  %v1385_v28 = vunpack.c.l.s4 %v2051_v27  ;;  %v652_v29 = vld [vmem:[%s2705_s4] sm:$0xf] }
 0x13c   :  { %946 = vmatprep.mubr.bf16.mxu1 %v2050_v61  ;;  %1107 = vmatprep.mubr.bf16.mxu0 %v2050_v61  ;;  %vm1470_vm4 = vcmp.lt.s32.totalorder %v654_v23, 200 }
 0x13d   :  { %v396_v34 = vadd.f32 %v1783_v33, %v2415_v63  ;;  %v446_v36 = vmax.f32 %v393_v32, 0.0  ;;  %v2519_v26 = vsub.s32 0, %v655_v25  ;;  %v668_v31 = vsub.s32 3, %v655_v25 }
 0x13e   :  { %v2527_v32 = vld.sshfl [vmem:[%s2706_s5] sm:$0x11 pattern:$0x75316420]  ;;  %v1386_v33 = vunpack.c.0.s8 %v1385_v28 }
 0x13f   :  { %v447_v37 = vmax.f32 %v396_v34, 0.0  ;;  %v1784_v38 = vpop.f32.mrb[36].mxu0  ;;  %v1383_v34 = vcombine.high %v2527_v32, %v2527_v32 }
 0x140   :  { %v1785_v39 = vpop.f32.mrb[37].mxu0 }
 0x141   :  { %v1786_v40 = vadd.f32 %v1785_v39, %v1784_v38  ;;  %v1787_v41 = vpop.f32.mrb[38].mxu0  ;;  %v2483_v42 = vpack.c.bf16 %v447_v37, %v446_v36  ;;  %v2532_v36 = vrot.slane %v652_v29, %v2519_v26  ;;  %v2536_v38 = vsub.s32 %v1386_v33, %v655_v25 }
 0x142   :  { %v1788_v43 = vpop.f32.mrb[39].mxu0 }
 0x143   :  { %v401_v44 = vadd.f32 %v1786_v40, %v2415_v63  ;;  %v1789_v45 = vadd.f32 %v1788_v43, %v1787_v41  ;;  %947 = vmatmul.mubr.bf16.gmra.mrb[32].mxu1 %v2483_v42  ;;  %1108 = vmatmul.mubr.bf16.gmra.mrb[84].mxu0 %v2483_v42  ;;  %v2540_v43 = vrot.slane %v652_v29, %v668_v31 }
 0x144   :  { %956 = vmatprep.mubr.bf16.mxu1 %v2050_v61  ;;  %1117 = vmatprep.mubr.bf16.mxu0 %v2050_v61 }
 0x145   :  { %v404_v47 = vadd.f32 %v1789_v45, %v2415_v63  ;;  %v448_v48 = vmax.f32 %v401_v44, 0.0 }
 0x147   :  { %v449_v49 = vmax.f32 %v404_v47, 0.0  ;;  %v1790_v50 = vpop.f32.mrb[40].mxu0  ;;  %v1397_v47 = vrot.slane %v1383_v34, %v2536_v38 }
 0x148   :  { %v1791_v51 = vpop.f32.mrb[41].mxu0 }
 0x149   :  { %v1792_v52 = vadd.f32 %v1791_v51, %v1790_v50  ;;  %v1793_v53 = vpop.f32.mrb[42].mxu0  ;;  %v2491_v54 = vpack.c.bf16 %v449_v49, %v448_v48 }
 0x14a   :  { %v1794_v55 = vpop.f32.mrb[43].mxu0 }
 0x14b   :  { %v409_v56 = vadd.f32 %v1792_v52, %v2415_v63  ;;  %v1795_v58 = vadd.f32 %v1794_v55, %v1793_v53  ;;  %957 = vmatmul.mubr.bf16.gmra.mrb[36].mxu1 %v2491_v54  ;;  %1118 = vmatmul.mubr.bf16.gmra.mrb[88].mxu0 %v2491_v54 }
 0x14c   :  { %966 = vmatprep.mubr.bf16.mxu1 %v2050_v61  ;;  %1127 = vmatprep.mubr.bf16.mxu0 %v2050_v61 }
 0x14d   :  { %v412_v59 = vadd.f32 %v1795_v58, %v2415_v63  ;;  %v450_v60 = vmax.f32 %v409_v56, 0.0 }
 0x14f   :  { %v451_v62 = vmax.f32 %v412_v59, 0.0  ;;  %v1796_v0 = vpop.f32.mrb[44].mxu0 }
 0x150   :  { %v1797_v1 = vpop.f32.mrb[45].mxu0 }
 0x151   :  { %v1798_v2 = vadd.f32 %v1797_v1, %v1796_v0  ;;  %v1799_v3 = vpop.f32.mrb[46].mxu0  ;;  %v2499_v4 = vpack.c.bf16 %v451_v62, %v450_v60 }
 0x152   :  { %v1800_v5 = vpop.f32.mrb[47].mxu0 }
 0x153   :  { %v417_v7 = vadd.f32 %v1798_v2, %v2415_v63  ;;  %v1801_v8 = vadd.f32 %v1800_v5, %v1799_v3  ;;  %967 = vmatmul.mubr.bf16.gmra.mrb[40].mxu1 %v2499_v4  ;;  %1128 = vmatmul.mubr.bf16.gmra.mrb[92].mxu0 %v2499_v4 }
 0x154   :  { %976 = vmatprep.mubr.bf16.mxu1 %v2050_v61  ;;  %1137 = vmatprep.mubr.bf16.mxu0 %v2050_v61 }
 0x155   :  { %v420_v9 = vadd.f32 %v1801_v8, %v2415_v63  ;;  %v452_v10 = vmax.f32 %v417_v7, 0.0 }
 0x157   :  { %v453_v11 = vmax.f32 %v420_v9, 0.0  ;;  %v1802_v12 = vpop.f32.mrb[48].mxu0 }
 0x158   :  { %v1803_v14 = vpop.f32.mrb[49].mxu0 }
 0x159   :  { %v1804_v15 = vadd.f32 %v1803_v14, %v1802_v12  ;;  %v1805_v16 = vpop.f32.mrb[50].mxu0  ;;  %v2507_v17 = vpack.c.bf16 %v453_v11, %v452_v10 }
 0x15a   :  { %v1806_v19 = vpop.f32.mrb[51].mxu0 }
 0x15b   :  { %v425_v20 = vadd.f32 %v1804_v15, %v2415_v63  ;;  %977 = vmatmul.mubr.bf16.gmra.mrb[44].mxu1 %v2507_v17  ;;  %1138 = vmatmul.mubr.bf16.gmra.mrb[96].mxu0 %v2507_v17  ;;  %v664_v63 = vsub.s32 2, %v655_v25 }
 0x15c   :  { %986 = vmatprep.mubr.bf16.mxu1 %v2050_v61  ;;  %1147 = vmatprep.mubr.bf16.mxu0 %v2050_v61  ;;  %v660_v61 = vsub.s32 1, %v655_v25 }
 0x15d   :  { %v2514_v21 = vmax.f32 %v425_v20, 0.0  ;;  %v2534_v37 = vrot.slane %v652_v29, %v664_v63 }
 0x15e   :  { %v2538_v41 = vrot.slane %v652_v29, %v660_v61 }
 0x15f   :  { %v619_v22 = vpack.c.bf16 %v2514_v21, %v2514_v21 }
 0x163   :  { %987 = vmatmul.mubr.bf16.gmra.mrb[48].mxu1 %v619_v22  ;;  %1148 = vmatmul.mubr.bf16.gmra.mrb[100].mxu0 %v619_v22 }
 0x164   :  { %1432 = vmatprep.mubr.bf16.mxu1 %v1397_v47 }
 0x1d6   :  { %v868_v39 = vpop.f32.mrb[0].mxu1  ;;  %v1029_v40 = vpop.f32.mrb[52].mxu0 }
 0x1d7   :  { %v870_v44 = vpop.f32.mrb[1].mxu1  ;;  %v1031_v45 = vpop.f32.mrb[53].mxu0  ;;  %v869_v50 = vadd.f32 %v868_v39, %v2532_v36  ;;  %v1030_v51 = vadd.f32 %v1029_v40, %v2534_v37 }
 0x1d8   :  { %v872_v48 = vpop.f32.mrb[2].mxu1  ;;  %v1033_v49 = vpop.f32.mrb[54].mxu0  ;;  %v871_v58 = vadd.f32 %v870_v44, %v2538_v41  ;;  %v1032_v59 = vadd.f32 %v1031_v45, %v2540_v43 }
 0x1d9   :  { %v873_v52 = vadd.f32 %v872_v48, %v2532_v36  ;;  %v1034_v53 = vadd.f32 %v1033_v49, %v2534_v37  ;;  %v874_v55 = vpop.f32.mrb[3].mxu1  ;;  %v1035_v56 = vpop.f32.mrb[55].mxu0 }
 0x1da   :  { %v875_v60 = vadd.f32 %v874_v55, %v2538_v41  ;;  %v1036_v62 = vadd.f32 %v1035_v56, %v2540_v43 }
 0x1db   :  { %v1156_v0 = vpack.c.bf16 %v873_v52, %v869_v50  ;;  %v1158_v1 = vpack.c.bf16 %v1034_v53, %v1030_v51 }
 0x1dc   :  { %v1157_v2 = vpack.c.bf16 %v875_v60, %v871_v58  ;;  %v1159_v3 = vpack.c.bf16 %v1036_v62, %v1032_v59 }
 0x1dd   :  { %v1234_v5 = vmul.bf16 1056980736, %v1158_v1 }
 0x1de   :  { %v1235_v7 = vmul.bf16 1056980736, %v1159_v3  ;;  %v878_v8 = vpop.f32.mrb[4].mxu1  ;;  %v1039_v9 = vpop.f32.mrb[56].mxu0 }
 0x1df   :  { %1916 = vtanh.bf16 %v1234_v5  ;;  %v880_v10 = vpop.f32.mrb[5].mxu1  ;;  %v1041_v11 = vpop.f32.mrb[57].mxu0  ;;  %v879_v15 = vadd.f32 %v878_v8, %v2532_v36  ;;  %v1040_v16 = vadd.f32 %v1039_v9, %v2534_v37 }
 0x1e0   :  { %1918 = vtanh.bf16 %v1235_v7  ;;  %v882_v12 = vpop.f32.mrb[6].mxu1  ;;  %v1043_v14 = vpop.f32.mrb[58].mxu0  ;;  %v881_v63 = vadd.f32 %v880_v10, %v2538_v41  ;;  %v1042_v27 = vadd.f32 %v1041_v11, %v2540_v43 }
 0x1e1   :  { %v883_v19 = vadd.f32 %v882_v12, %v2532_v36  ;;  %v1044_v20 = vadd.f32 %v1043_v14, %v2534_v37  ;;  %v884_v22 = vpop.f32.mrb[7].mxu1  ;;  %v1045_v25 = vpop.f32.mrb[59].mxu0  ;;  %1920 = vtanh.bf16 %v1156_v0 }
 0x1e2   :  { %v885_v28 = vadd.f32 %v884_v22, %v2538_v41  ;;  %v1046_v29 = vadd.f32 %v1045_v25, %v2540_v43  ;;  %1922 = vtanh.bf16 %v1157_v2 }
 0x1e3   :  { %v1160_v61 = vpack.c.bf16 %v883_v19, %v879_v15  ;;  %v1162_v31 = vpack.c.bf16 %v1044_v20, %v1040_v16 }
 0x1e4   :  { %v1161_v33 = vpack.c.bf16 %v885_v28, %v881_v63  ;;  %v1163_v34 = vpack.c.bf16 %v1046_v29, %v1042_v27 }
 0x1e5   :  { %v1236_v39 = vmul.bf16 1056980736, %v1162_v31 }
 0x1e6   :  { %v1237_v40 = vmul.bf16 1056980736, %v1163_v34  ;;  %v888_v44 = vpop.f32.mrb[8].mxu1  ;;  %v1049_v45 = vpop.f32.mrb[60].mxu0 }
 0x1e7   :  { %1924 = vtanh.bf16 %v1236_v39  ;;  %v890_v47 = vpop.f32.mrb[9].mxu1  ;;  %v1051_v48 = vpop.f32.mrb[61].mxu0  ;;  %v889_v51 = vadd.f32 %v888_v44, %v2532_v36  ;;  %v1050_v52 = vadd.f32 %v1049_v45, %v2534_v37 }
 0x1e8   :  { %1926 = vtanh.bf16 %v1237_v40  ;;  %v892_v49 = vpop.f32.mrb[10].mxu1  ;;  %v1053_v50 = vpop.f32.mrb[62].mxu0  ;;  %v891_v60 = vadd.f32 %v890_v47, %v2538_v41  ;;  %v1052_v62 = vadd.f32 %v1051_v48, %v2540_v43 }
 0x1e9   :  { %v893_v53 = vadd.f32 %v892_v49, %v2532_v36  ;;  %v1054_v55 = vadd.f32 %v1053_v50, %v2534_v37  ;;  %v894_v56 = vpop.f32.mrb[11].mxu1  ;;  %v1055_v58 = vpop.f32.mrb[63].mxu0  ;;  %1928 = vtanh.bf16 %v1160_v61 }
 0x1ea   :  { %v1917_v59 = vpop.eup %1916  ;;  %v895_v0 = vadd.f32 %v894_v56, %v2538_v41  ;;  %v1056_v1 = vadd.f32 %v1055_v58, %v2540_v43  ;;  %1930 = vtanh.bf16 %v1161_v33 }
 0x1eb   :  { %v1919_v2 = vpop.eup %1918  ;;  %v1286_v3 = vadd.bf16 1065369472, %v1917_v59  ;;  %v1164_v5 = vpack.c.bf16 %v893_v53, %v889_v51  ;;  %v1166_v7 = vpack.c.bf16 %v1054_v55, %v1050_v52 }
 0x1ec   :  { %v1165_v8 = vpack.c.bf16 %v895_v0, %v891_v60  ;;  %v1167_v9 = vpack.c.bf16 %v1056_v1, %v1052_v62  ;;  %v1287_v10 = vadd.bf16 1065369472, %v1919_v2  ;;  %v1921_v14 = vpop.eup %1920 }
 0x1ed   :  { %v1312_v11 = vmul.bf16 1056980736, %v1286_v3  ;;  %v1238_v12 = vmul.bf16 1056980736, %v1166_v7  ;;  %v1923_v22 = vpop.eup %1922 }
 0x1ee   :  { %v1239_v15 = vmul.bf16 1056980736, %v1167_v9  ;;  %v898_v16 = vpop.f32.mrb[12].mxu1  ;;  %v1059_v19 = vpop.f32.mrb[64].mxu0  ;;  %v1313_v20 = vmul.bf16 1056980736, %v1287_v10 }
 0x1ef   :  { %1932 = vtanh.bf16 %v1238_v12  ;;  %v900_v25 = vpop.f32.mrb[13].mxu1  ;;  %v1061_v63 = vpop.f32.mrb[65].mxu0  ;;  %v1338_v27 = vmul.bf16 %v1921_v14, %v1312_v11  ;;  %v899_v31 = vadd.f32 %v898_v16, %v2532_v36  ;;  %v1060_v33 = vadd.f32 %v1059_v19, %v2534_v37 }
 0x1f0   :  { %1934 = vtanh.bf16 %v1239_v15  ;;  %v902_v28 = vpop.f32.mrb[14].mxu1  ;;  %v1063_v29 = vpop.f32.mrb[66].mxu0  ;;  %v1339_v61 = vmul.bf16 %v1923_v22, %v1313_v20  ;;  %v901_v47 = vadd.f32 %v900_v25, %v2538_v41  ;;  %v1062_v48 = vadd.f32 %v1061_v63, %v2540_v43 }
 0x1f1   :  { %v903_v34 = vadd.f32 %v902_v28, %v2532_v36  ;;  %v1064_v39 = vadd.f32 %v1063_v29, %v2534_v37  ;;  %v904_v40 = vpop.f32.mrb[15].mxu1  ;;  %v1065_v44 = vpop.f32.mrb[67].mxu0  ;;  %1936 = vtanh.bf16 %v1164_v5 }
 0x1f2   :  { %v1925_v45 = vpop.eup %1924  ;;  %v905_v49 = vadd.f32 %v904_v40, %v2538_v41  ;;  %v1066_v50 = vadd.f32 %v1065_v44, %v2540_v43  ;;  %1400 = vmatprep.subr.bf16.mxu1 %v1339_v61  ;;  %1938 = vtanh.bf16 %v1165_v8 }
 0x1f3   :  { %v1927_v51 = vpop.eup %1926  ;;  %v1288_v52 = vadd.bf16 1065369472, %v1925_v45  ;;  %v1168_v53 = vpack.c.bf16 %v903_v34, %v899_v31  ;;  %v1170_v55 = vpack.c.bf16 %v1064_v39, %v1060_v33  ;;  %1401 = vmatpush1.bf16.xpose.msra.mxu1 %v1338_v27 }
 0x1f4   :  { %v1169_v56 = vpack.c.bf16 %v905_v49, %v901_v47  ;;  %v1171_v58 = vpack.c.bf16 %v1066_v50, %v1062_v48  ;;  %v1289_v59 = vadd.bf16 1065369472, %v1927_v51  ;;  %v1929_v0 = vpop.eup %1928 }
 0x1f5   :  { %v1314_v60 = vmul.bf16 1056980736, %v1288_v52  ;;  %v1240_v62 = vmul.bf16 1056980736, %v1170_v55  ;;  %v1931_v9 = vpop.eup %1930 }
 0x1f6   :  { %v1241_v1 = vmul.bf16 1056980736, %v1171_v58  ;;  %v908_v2 = vpop.f32.mrb[16].mxu1  ;;  %v1069_v3 = vpop.f32.mrb[68].mxu0  ;;  %v1315_v7 = vmul.bf16 1056980736, %v1289_v59 }
 0x1f7   :  { %1940 = vtanh.bf16 %v1240_v62  ;;  %v910_v10 = vpop.f32.mrb[17].mxu1  ;;  %v1071_v11 = vpop.f32.mrb[69].mxu0  ;;  %v1340_v12 = vmul.bf16 %v1929_v0, %v1314_v60  ;;  %v909_v8 = vadd.f32 %v908_v2, %v2532_v36  ;;  %v1070_v16 = vadd.f32 %v1069_v3, %v2534_v37 }
 0x1f8   :  { %1942 = vtanh.bf16 %v1241_v1  ;;  %v912_v5 = vpop.f32.mrb[18].mxu1  ;;  %v1073_v14 = vpop.f32.mrb[70].mxu0  ;;  %v1341_v15 = vmul.bf16 %v1931_v9, %v1315_v7  ;;  %v911_v27 = vadd.f32 %v910_v10, %v2538_v41  ;;  %v1072_v28 = vadd.f32 %v1071_v11, %v2540_v43 }
 0x1f9   :  { %v913_v19 = vadd.f32 %v912_v5, %v2532_v36  ;;  %v1074_v20 = vadd.f32 %v1073_v14, %v2534_v37  ;;  %v914_v22 = vpop.f32.mrb[19].mxu1  ;;  %v1075_v25 = vpop.f32.mrb[71].mxu0  ;;  %1944 = vtanh.bf16 %v1168_v53 }
 0x1fa   :  { %v1933_v63 = vpop.eup %1932  ;;  %v915_v29 = vadd.f32 %v914_v22, %v2538_v41  ;;  %v1076_v61 = vadd.f32 %v1075_v25, %v2540_v43  ;;  %1402 = vmatprep.subr.bf16.mxu1 %v1341_v15  ;;  %1946 = vtanh.bf16 %v1169_v56 }
 0x1fb   :  { %v1935_v31 = vpop.eup %1934  ;;  %v1290_v33 = vadd.bf16 1065369472, %v1933_v63  ;;  %v1172_v34 = vpack.c.bf16 %v913_v19, %v909_v8  ;;  %v1174_v39 = vpack.c.bf16 %v1074_v20, %v1070_v16  ;;  %1403 = vmatpush1.bf16.xpose.msra.mxu1 %v1340_v12 }
 0x1fc   :  { %v1173_v40 = vpack.c.bf16 %v915_v29, %v911_v27  ;;  %v1175_v44 = vpack.c.bf16 %v1076_v61, %v1072_v28  ;;  %v1291_v45 = vadd.bf16 1065369472, %v1935_v31  ;;  %v1937_v49 = vpop.eup %1936 }
 0x1fd   :  { %v1316_v47 = vmul.bf16 1056980736, %v1290_v33  ;;  %v1242_v48 = vmul.bf16 1056980736, %v1174_v39  ;;  %v1939_v58 = vpop.eup %1938 }
 0x1fe   :  { %v1243_v50 = vmul.bf16 1056980736, %v1175_v44  ;;  %v918_v51 = vpop.f32.mrb[20].mxu1  ;;  %v1079_v52 = vpop.f32.mrb[72].mxu0  ;;  %v1317_v55 = vmul.bf16 1056980736, %v1291_v45 }
 0x1ff   :  { %1948 = vtanh.bf16 %v1242_v48  ;;  %v920_v59 = vpop.f32.mrb[21].mxu1  ;;  %v1081_v60 = vpop.f32.mrb[73].mxu0  ;;  %v1342_v62 = vmul.bf16 %v1937_v49, %v1316_v47  ;;  %v919_v56 = vadd.f32 %v918_v51, %v2532_v36  ;;  %v1080_v2 = vadd.f32 %v1079_v52, %v2534_v37 }
 0x200   :  { %1950 = vtanh.bf16 %v1243_v50  ;;  %v922_v53 = vpop.f32.mrb[22].mxu1  ;;  %v1083_v0 = vpop.f32.mrb[74].mxu0  ;;  %v1343_v1 = vmul.bf16 %v1939_v58, %v1317_v55  ;;  %v921_v12 = vadd.f32 %v920_v59, %v2538_v41  ;;  %v1082_v5 = vadd.f32 %v1081_v60, %v2540_v43 }
 0x201   :  { %v923_v3 = vadd.f32 %v922_v53, %v2532_v36  ;;  %v1084_v7 = vadd.f32 %v1083_v0, %v2534_v37  ;;  %v924_v9 = vpop.f32.mrb[23].mxu1  ;;  %v1085_v10 = vpop.f32.mrb[75].mxu0  ;;  %1952 = vtanh.bf16 %v1172_v34 }
 0x202   :  { %v1941_v11 = vpop.eup %1940  ;;  %v925_v14 = vadd.f32 %v924_v9, %v2538_v41  ;;  %v1086_v15 = vadd.f32 %v1085_v10, %v2540_v43  ;;  %1404 = vmatprep.subr.bf16.mxu1 %v1343_v1  ;;  %1954 = vtanh.bf16 %v1173_v40  ;;  %v1365_v10 = vld [vmem:[#allocation5] sm:$0x1] }
 0x203   :  { %v1943_v8 = vpop.eup %1942  ;;  %v1292_v16 = vadd.bf16 1065369472, %v1941_v11  ;;  %v1176_v19 = vpack.c.bf16 %v923_v3, %v919_v56  ;;  %v1178_v20 = vpack.c.bf16 %v1084_v7, %v1080_v2  ;;  %1405 = vmatpush1.bf16.xpose.msra.mxu1 %v1342_v62  ;;  %v2052_v56 = vmov 0.0   ;;  %1368 = vperm.xlu0 %1850, %v1365_v10  }
 0x204   :  { %v1177_v22 = vpack.c.bf16 %v925_v14, %v921_v12  ;;  %v1179_v25 = vpack.c.bf16 %v1086_v15, %v1082_v5  ;;  %v1293_v63 = vadd.bf16 1065369472, %v1943_v8  ;;  %v1945_v29 = vpop.eup %1944  ;;  %81 = vst.msk [vmem:[#allocation3] sm:$0x1] %vm79_vm0, %v2052_v56  ;;  %82 = vst [vmem:[#allocation4] sm:$0x1] %v2052_v56 }
 0x205   :  { %v1318_v27 = vmul.bf16 1056980736, %v1292_v16  ;;  %v1244_v28 = vmul.bf16 1056980736, %v1178_v20  ;;  %v1947_v44 = vpop.eup %1946 }
 0x206   :  { %v1245_v61 = vmul.bf16 1056980736, %v1179_v25  ;;  %v928_v31 = vpop.f32.mrb[24].mxu1  ;;  %v1089_v33 = vpop.f32.mrb[76].mxu0  ;;  %v1319_v39 = vmul.bf16 1056980736, %v1293_v63 }
 0x207   :  { %1956 = vtanh.bf16 %v1244_v28  ;;  %v930_v45 = vpop.f32.mrb[25].mxu1  ;;  %v1091_v47 = vpop.f32.mrb[77].mxu0  ;;  %v1344_v48 = vmul.bf16 %v1945_v29, %v1318_v27  ;;  %v929_v34 = vadd.f32 %v928_v31, %v2532_v36  ;;  %v1090_v40 = vadd.f32 %v1089_v33, %v2534_v37 }
 0x208   :  { %1958 = vtanh.bf16 %v1245_v61  ;;  %v932_v49 = vpop.f32.mrb[26].mxu1  ;;  %v1093_v50 = vpop.f32.mrb[78].mxu0  ;;  %v1345_v51 = vmul.bf16 %v1947_v44, %v1319_v39  ;;  %v931_v62 = vadd.f32 %v930_v45, %v2538_v41  ;;  %v1092_v53 = vadd.f32 %v1091_v47, %v2540_v43 }
 0x209   :  { %v933_v52 = vadd.f32 %v932_v49, %v2532_v36  ;;  %v1094_v55 = vadd.f32 %v1093_v50, %v2534_v37  ;;  %v934_v58 = vpop.f32.mrb[27].mxu1  ;;  %v1095_v59 = vpop.f32.mrb[79].mxu0  ;;  %1960 = vtanh.bf16 %v1176_v19 }
 0x20a   :  { %v1949_v60 = vpop.eup %1948  ;;  %v935_v0 = vadd.f32 %v934_v58, %v2538_v41  ;;  %v1096_v1 = vadd.f32 %v1095_v59, %v2540_v43  ;;  %1406 = vmatprep.subr.bf16.mxu1 %v1345_v51  ;;  %1962 = vtanh.bf16 %v1177_v22 }
 0x20b   :  { %v1951_v2 = vpop.eup %1950  ;;  %v1294_v3 = vadd.bf16 1065369472, %v1949_v60  ;;  %v1180_v7 = vpack.c.bf16 %v933_v52, %v929_v34  ;;  %v1182_v9 = vpack.c.bf16 %v1094_v55, %v1090_v40  ;;  %1407 = vmatpush1.bf16.xpose.msra.mxu1 %v1344_v48 }
 0x20c   :  { %v1181_v11 = vpack.c.bf16 %v935_v0, %v931_v62  ;;  %v1183_v12 = vpack.c.bf16 %v1096_v1, %v1092_v53  ;;  %v1295_v5 = vadd.bf16 1065369472, %v1951_v2  ;;  %v1953_v8 = vpop.eup %1952 }
 0x20d   :  { %v1320_v14 = vmul.bf16 1056980736, %v1294_v3  ;;  %v1246_v15 = vmul.bf16 1056980736, %v1182_v9  ;;  %v1955_v27 = vpop.eup %1954 }
 0x20e   :  { %v1247_v16 = vmul.bf16 1056980736, %v1183_v12  ;;  %v938_v20 = vpop.f32.mrb[28].mxu1  ;;  %v1099_v25 = vpop.f32.mrb[80].mxu0  ;;  %v1321_v63 = vmul.bf16 1056980736, %v1295_v5 }
 0x20f   :  { %1964 = vtanh.bf16 %v1246_v15  ;;  %v940_v28 = vpop.f32.mrb[29].mxu1  ;;  %v1101_v19 = vpop.f32.mrb[81].mxu0  ;;  %v1346_v29 = vmul.bf16 %v1953_v8, %v1320_v14  ;;  %v939_v33 = vadd.f32 %v938_v20, %v2532_v36  ;;  %v1100_v39 = vadd.f32 %v1099_v25, %v2534_v37 }
 0x210   :  { %1966 = vtanh.bf16 %v1247_v16  ;;  %v942_v61 = vpop.f32.mrb[30].mxu1  ;;  %v1103_v31 = vpop.f32.mrb[82].mxu0  ;;  %v1347_v22 = vmul.bf16 %v1955_v27, %v1321_v63  ;;  %v941_v40 = vadd.f32 %v940_v28, %v2538_v41  ;;  %v1102_v49 = vadd.f32 %v1101_v19, %v2540_v43 }
 0x211   :  { %v943_v44 = vadd.f32 %v942_v61, %v2532_v36  ;;  %v1104_v45 = vadd.f32 %v1103_v31, %v2534_v37  ;;  %v944_v47 = vpop.f32.mrb[31].mxu1  ;;  %v1105_v48 = vpop.f32.mrb[83].mxu0  ;;  %1968 = vtanh.bf16 %v1180_v7 }
 0x212   :  { %v1957_v34 = vpop.eup %1956  ;;  %v945_v50 = vadd.f32 %v944_v47, %v2538_v41  ;;  %v1106_v51 = vadd.f32 %v1105_v48, %v2540_v43  ;;  %1408 = vmatprep.subr.bf16.mxu1 %v1347_v22  ;;  %1970 = vtanh.bf16 %v1181_v11 }
 0x213   :  { %v1959_v52 = vpop.eup %1958  ;;  %v1296_v55 = vadd.bf16 1065369472, %v1957_v34  ;;  %v1184_v58 = vpack.c.bf16 %v943_v44, %v939_v33  ;;  %v1186_v59 = vpack.c.bf16 %v1104_v45, %v1100_v39  ;;  %1409 = vmatpush1.bf16.xpose.msra.mxu1 %v1346_v29 }
 0x214   :  { %v1185_v60 = vpack.c.bf16 %v945_v50, %v941_v40  ;;  %v1187_v62 = vpack.c.bf16 %v1106_v51, %v1102_v49  ;;  %v1297_v53 = vadd.bf16 1065369472, %v1959_v52  ;;  %v1961_v2 = vpop.eup %1960 }
 0x215   :  { %v1322_v0 = vmul.bf16 1056980736, %v1296_v55  ;;  %v1248_v1 = vmul.bf16 1056980736, %v1186_v59  ;;  %v1963_v5 = vpop.eup %1962 }
 0x216   :  { %v1249_v3 = vmul.bf16 1056980736, %v1187_v62  ;;  %v948_v9 = vpop.f32.mrb[32].mxu1  ;;  %v1109_v10 = vpop.f32.mrb[84].mxu0  ;;  %v1323_v12 = vmul.bf16 1056980736, %v1297_v53 }
 0x217   :  { %1972 = vtanh.bf16 %v1248_v1  ;;  %v950_v14 = vpop.f32.mrb[33].mxu1  ;;  %v1111_v15 = vpop.f32.mrb[85].mxu0  ;;  %v1348_v8 = vmul.bf16 %v1961_v2, %v1322_v0  ;;  %v949_v11 = vadd.f32 %v948_v9, %v2532_v36  ;;  %v1110_v25 = vadd.f32 %v1109_v10, %v2534_v37 }
 0x218   :  { %1974 = vtanh.bf16 %v1249_v3  ;;  %v952_v7 = vpop.f32.mrb[34].mxu1  ;;  %v1113_v16 = vpop.f32.mrb[86].mxu0  ;;  %v1349_v20 = vmul.bf16 %v1963_v5, %v1323_v12  ;;  %v951_v61 = vadd.f32 %v950_v14, %v2538_v41  ;;  %v1112_v31 = vadd.f32 %v1111_v15, %v2540_v43 }
 0x219   :  { %v953_v63 = vadd.f32 %v952_v7, %v2532_v36  ;;  %v1114_v27 = vadd.f32 %v1113_v16, %v2534_v37  ;;  %v954_v28 = vpop.f32.mrb[35].mxu1  ;;  %v1115_v19 = vpop.f32.mrb[87].mxu0  ;;  %1976 = vtanh.bf16 %v1184_v58 }
 0x21a   :  { %v1965_v29 = vpop.eup %1964  ;;  %v955_v22 = vadd.f32 %v954_v28, %v2538_v41  ;;  %v1116_v33 = vadd.f32 %v1115_v19, %v2540_v43  ;;  %1410 = vmatprep.subr.bf16.mxu1 %v1349_v20  ;;  %1978 = vtanh.bf16 %v1185_v60 }
 0x21b   :  { %v1967_v39 = vpop.eup %1966  ;;  %v1298_v44 = vadd.bf16 1065369472, %v1965_v29  ;;  %v1188_v45 = vpack.c.bf16 %v953_v63, %v949_v11  ;;  %v1190_v47 = vpack.c.bf16 %v1114_v27, %v1110_v25  ;;  %1411 = vmatpush1.bf16.xpose.msra.mxu1 %v1348_v8 }
 0x21c   :  { %v1189_v48 = vpack.c.bf16 %v955_v22, %v951_v61  ;;  %v1191_v34 = vpack.c.bf16 %v1116_v33, %v1112_v31  ;;  %v1299_v40 = vadd.bf16 1065369472, %v1967_v39  ;;  %v1969_v51 = vpop.eup %1968 }
 0x21d   :  { %v1324_v49 = vmul.bf16 1056980736, %v1298_v44  ;;  %v1250_v50 = vmul.bf16 1056980736, %v1190_v47  ;;  %v1971_v53 = vpop.eup %1970 }
 0x21e   :  { %v1251_v52 = vmul.bf16 1056980736, %v1191_v34  ;;  %v958_v55 = vpop.f32.mrb[36].mxu1  ;;  %v1119_v59 = vpop.f32.mrb[88].mxu0  ;;  %v1325_v62 = vmul.bf16 1056980736, %v1299_v40 }
 0x21f   :  { %1980 = vtanh.bf16 %v1250_v50  ;;  %v960_v0 = vpop.f32.mrb[37].mxu1  ;;  %v1121_v1 = vpop.f32.mrb[89].mxu0  ;;  %v1350_v2 = vmul.bf16 %v1969_v51, %v1324_v49  ;;  %v959_v60 = vadd.f32 %v958_v55, %v2532_v36  ;;  %v1120_v10 = vadd.f32 %v1119_v59, %v2534_v37 }
 0x220   :  { %1982 = vtanh.bf16 %v1251_v52  ;;  %v962_v58 = vpop.f32.mrb[38].mxu1  ;;  %v1123_v3 = vpop.f32.mrb[90].mxu0  ;;  %v1351_v9 = vmul.bf16 %v1971_v53, %v1325_v62  ;;  %v961_v7 = vadd.f32 %v960_v0, %v2538_v41  ;;  %v1122_v16 = vadd.f32 %v1121_v1, %v2540_v43 }
 0x221   :  { %v963_v12 = vadd.f32 %v962_v58, %v2532_v36  ;;  %v1124_v5 = vadd.f32 %v1123_v3, %v2534_v37  ;;  %v964_v14 = vpop.f32.mrb[39].mxu1  ;;  %v1125_v15 = vpop.f32.mrb[91].mxu0  ;;  %1984 = vtanh.bf16 %v1188_v45 }
 0x222   :  { %v1973_v8 = vpop.eup %1972  ;;  %v965_v20 = vadd.f32 %v964_v14, %v2538_v41  ;;  %v1126_v11 = vadd.f32 %v1125_v15, %v2540_v43  ;;  %1412 = vmatprep.subr.bf16.mxu1 %v1351_v9  ;;  %1986 = vtanh.bf16 %v1189_v48 }
 0x223   :  { %v1975_v25 = vpop.eup %1974  ;;  %v1300_v63 = vadd.bf16 1065369472, %v1973_v8  ;;  %v1192_v27 = vpack.c.bf16 %v963_v12, %v959_v60  ;;  %v1194_v28 = vpack.c.bf16 %v1124_v5, %v1120_v10  ;;  %1413 = vmatpush1.bf16.xpose.msra.mxu1 %v1350_v2 }
 0x224   :  { %v1193_v19 = vpack.c.bf16 %v965_v20, %v961_v7  ;;  %v1195_v29 = vpack.c.bf16 %v1126_v11, %v1122_v16  ;;  %v1301_v61 = vadd.bf16 1065369472, %v1975_v25  ;;  %v1977_v33 = vpop.eup %1976 }
 0x225   :  { %v1326_v31 = vmul.bf16 1056980736, %v1300_v63  ;;  %v1252_v22 = vmul.bf16 1056980736, %v1194_v28  ;;  %v1979_v40 = vpop.eup %1978 }
 0x226   :  { %v1253_v39 = vmul.bf16 1056980736, %v1195_v29  ;;  %v968_v44 = vpop.f32.mrb[40].mxu1  ;;  %v1129_v47 = vpop.f32.mrb[92].mxu0  ;;  %v1327_v34 = vmul.bf16 1056980736, %v1301_v61 }
 0x227   :  { %1988 = vtanh.bf16 %v1252_v22  ;;  %v970_v49 = vpop.f32.mrb[41].mxu1  ;;  %v1131_v50 = vpop.f32.mrb[93].mxu0  ;;  %v1352_v51 = vmul.bf16 %v1977_v33, %v1326_v31  ;;  %v969_v48 = vadd.f32 %v968_v44, %v2532_v36  ;;  %v1130_v59 = vadd.f32 %v1129_v47, %v2534_v37 }
 0x228   :  { %1990 = vtanh.bf16 %v1253_v39  ;;  %v972_v45 = vpop.f32.mrb[42].mxu1  ;;  %v1133_v52 = vpop.f32.mrb[94].mxu0  ;;  %v1353_v55 = vmul.bf16 %v1979_v40, %v1327_v34  ;;  %v971_v58 = vadd.f32 %v970_v49, %v2538_v41  ;;  %v1132_v3 = vadd.f32 %v1131_v50, %v2540_v43 }
 0x229   :  { %v973_v62 = vadd.f32 %v972_v45, %v2532_v36  ;;  %v1134_v53 = vadd.f32 %v1133_v52, %v2534_v37  ;;  %v974_v0 = vpop.f32.mrb[43].mxu1  ;;  %v1135_v1 = vpop.f32.mrb[95].mxu0  ;;  %1992 = vtanh.bf16 %v1192_v27 }
 0x22a   :  { %v1981_v2 = vpop.eup %1980  ;;  %v975_v9 = vadd.f32 %v974_v0, %v2538_v41  ;;  %v1136_v60 = vadd.f32 %v1135_v1, %v2540_v43  ;;  %1414 = vmatprep.subr.bf16.mxu1 %v1353_v55  ;;  %1994 = vtanh.bf16 %v1193_v19 }
 0x22b   :  { %v1983_v10 = vpop.eup %1982  ;;  %v1302_v12 = vadd.bf16 1065369472, %v1981_v2  ;;  %v1196_v5 = vpack.c.bf16 %v973_v62, %v969_v48  ;;  %v1198_v14 = vpack.c.bf16 %v1134_v53, %v1130_v59  ;;  %1415 = vmatpush1.bf16.xpose.msra.mxu1 %v1352_v51 }
 0x22c   :  { %v1197_v15 = vpack.c.bf16 %v975_v9, %v971_v58  ;;  %v1199_v8 = vpack.c.bf16 %v1136_v60, %v1132_v3  ;;  %v1303_v7 = vadd.bf16 1065369472, %v1983_v10  ;;  %v1985_v11 = vpop.eup %1984 }
 0x22d   :  { %v1328_v16 = vmul.bf16 1056980736, %v1302_v12  ;;  %v1254_v20 = vmul.bf16 1056980736, %v1198_v14  ;;  %v1987_v61 = vpop.eup %1986 }
 0x22e   :  { %v1255_v25 = vmul.bf16 1056980736, %v1199_v8  ;;  %v978_v63 = vpop.f32.mrb[44].mxu1  ;;  %v1139_v28 = vpop.f32.mrb[96].mxu0  ;;  %v1329_v29 = vmul.bf16 1056980736, %v1303_v7 }
 0x22f   :  { %1996 = vtanh.bf16 %v1254_v20  ;;  %v980_v31 = vpop.f32.mrb[45].mxu1  ;;  %v1141_v22 = vpop.f32.mrb[97].mxu0  ;;  %v1354_v33 = vmul.bf16 %v1985_v11, %v1328_v16  ;;  %v979_v19 = vadd.f32 %v978_v63, %v2532_v36  ;;  %v1140_v47 = vadd.f32 %v1139_v28, %v2534_v37 }
 0x230   :  { %1998 = vtanh.bf16 %v1255_v25  ;;  %v982_v27 = vpop.f32.mrb[46].mxu1  ;;  %v1143_v39 = vpop.f32.mrb[98].mxu0  ;;  %v1355_v44 = vmul.bf16 %v1987_v61, %v1329_v29  ;;  %v981_v45 = vadd.f32 %v980_v31, %v2538_v41  ;;  %v1142_v52 = vadd.f32 %v1141_v22, %v2540_v43 }
 0x231   :  { %v983_v34 = vadd.f32 %v982_v27, %v2532_v36  ;;  %v1144_v40 = vadd.f32 %v1143_v39, %v2534_v37  ;;  %v984_v49 = vpop.f32.mrb[47].mxu1  ;;  %v1145_v50 = vpop.f32.mrb[99].mxu0  ;;  %2000 = vtanh.bf16 %v1196_v5 }
 0x232   :  { %v1989_v51 = vpop.eup %1988  ;;  %v985_v55 = vadd.f32 %v984_v49, %v2538_v41  ;;  %v1146_v48 = vadd.f32 %v1145_v50, %v2540_v43  ;;  %1416 = vmatprep.subr.bf16.mxu1 %v1355_v44  ;;  %2002 = vtanh.bf16 %v1197_v15 }
 0x233   :  { %v1991_v59 = vpop.eup %1990  ;;  %v1304_v62 = vadd.bf16 1065369472, %v1989_v51  ;;  %v1200_v53 = vpack.c.bf16 %v983_v34, %v979_v19  ;;  %v1202_v0 = vpack.c.bf16 %v1144_v40, %v1140_v47  ;;  %1417 = vmatpush1.bf16.xpose.msra.mxu1 %v1354_v33 }
 0x234   :  { %v1201_v1 = vpack.c.bf16 %v985_v55, %v981_v45  ;;  %v1203_v2 = vpack.c.bf16 %v1146_v48, %v1142_v52  ;;  %v1305_v58 = vadd.bf16 1065369472, %v1991_v59  ;;  %v1993_v60 = vpop.eup %1992 }
 0x235   :  { %v1330_v3 = vmul.bf16 1056980736, %v1304_v62  ;;  %v1256_v9 = vmul.bf16 1056980736, %v1202_v0  ;;  %v1995_v7 = vpop.eup %1994 }
 0x236   :  { %v1257_v10 = vmul.bf16 1056980736, %v1203_v2  ;;  %v988_v12 = vpop.f32.mrb[48].mxu1  ;;  %v1149_v14 = vpop.f32.mrb[100].mxu0  ;;  %v1331_v8 = vmul.bf16 1056980736, %v1305_v58 }
 0x237   :  { %2004 = vtanh.bf16 %v1256_v9  ;;  %v1150_v16 = vadd.f32 %v1149_v14, %v2534_v37  ;;  %v990_v20 = vpop.f32.mrb[49].mxu1  ;;  %v1151_v5 = vpop.f32.mrb[101].mxu0  ;;  %v1356_v11 = vmul.bf16 %v1993_v60, %v1330_v3  ;;  %v989_v29 = vadd.f32 %v988_v12, %v2532_v36 }
 0x238   :  { %2006 = vtanh.bf16 %v1257_v10  ;;  %v1152_v15 = vadd.f32 %v1151_v5, %v2540_v43  ;;  %v992_v25 = vpop.f32.mrb[50].mxu1  ;;  %v1153_v63 = vpop.f32.mrb[102].mxu0  ;;  %v1357_v28 = vmul.bf16 %v1995_v7, %v1331_v8  ;;  %v991_v27 = vadd.f32 %v990_v20, %v2538_v41 }
 0x239   :  { %v1206_v61 = vpack.c.bf16 %v1150_v16, %v1150_v16  ;;  %v993_v31 = vpop.f32.mrb[51].mxu1  ;;  %v1154_v22 = vpop.f32.mrb[103].mxu0  ;;  %2008 = vtanh.bf16 %v1200_v53  ;;  %v1204_v40 = vpack.c.bf16 %v989_v29, %v989_v29  ;;  %v2053_v5 = vmov 0.0|0.0  }
 0x23a   :  { %v1997_v33 = vpop.eup %1996  ;;  %v1207_v39 = vpack.c.bf16 %v1152_v15, %v1152_v15  ;;  %1418 = vmatprep.subr.bf16.mxu1 %v1357_v28  ;;  %2010 = vtanh.bf16 %v1201_v1  ;;  %v1205_v49 = vpack.c.bf16 %v991_v27, %v991_v27  ;;  %v2054_v63 = vmov -1e+30  }
 0x23b   :  { %v1999_v37 = vpop.eup %1998  ;;  %v1306_v44 = vadd.bf16 1065369472, %v1997_v33  ;;  %v1258_v19 = vmul.bf16 1056980736, %v1206_v61  ;;  %1419 = vmatpush1.bf16.xpose.msra.mxu1 %v1356_v11  ;;  %v1390_v11 = vrot.slane %v2527_v32, %v2536_v38  ;;  %80 = vst.msk [vmem:[#allocation2] sm:$0x1] %vm79_vm0, %v2054_v63 }
 0x23c   :  { %v1259_v43 = vmul.bf16 1056980736, %v1207_v39  ;;  %v1307_v47 = vadd.bf16 1065369472, %v1999_v37  ;;  %v2001_v36 = vpop.eup %2000 }
 0x23d   :  { %v1332_v34 = vmul.bf16 1056980736, %v1306_v44  ;;  %2012 = vtanh.bf16 %v1258_v19  ;;  %v2003_v51 = vpop.eup %2002 }
 0x23e   :  { %2014 = vtanh.bf16 %v1259_v43  ;;  %v1333_v50 = vmul.bf16 1056980736, %v1307_v47 }
 0x23f   :  { %v1358_v45 = vmul.bf16 %v2001_v36, %v1332_v34  ;;  %2016 = vtanh.bf16 %v1204_v40 }
 0x240   :  { %v1359_v41 = vmul.bf16 %v2003_v51, %v1333_v50  ;;  %2018 = vtanh.bf16 %v1205_v49  ;;  %v1502_v50 = vld [vmem:[#allocation3] sm:$0x1] }
 0x242   :  { %v2005_v52 = vpop.eup %2004  ;;  %1420 = vmatprep.subr.bf16.mxu1 %v1359_v41  ;;  %v1473_v28 = vld [vmem:[#allocation2] sm:$0x1] }
 0x243   :  { %v2007_v55 = vpop.eup %2006  ;;  %v1308_v48 = vadd.bf16 1065369472, %v2005_v52  ;;  %1421 = vmatpush1.bf16.xpose.msra.mxu1 %v1358_v45 }
 0x244   :  { %v1309_v59 = vadd.bf16 1065369472, %v2007_v55  ;;  %v2009_v53 = vpop.eup %2008 }
 0x245   :  { %v1334_v62 = vmul.bf16 1056980736, %v1308_v48  ;;  %v2011_v1 = vpop.eup %2010 }
 0x246   :  { %v1335_v0 = vmul.bf16 1056980736, %v1309_v59 }
 0x247   :  { %v1360_v2 = vmul.bf16 %v2009_v53, %v1334_v62 }
 0x248   :  { %v2013_v58 = vpop.eup %2012  ;;  %v1361_v3 = vmul.bf16 %v2011_v1, %v1335_v0 }
 0x249   :  { %v2015_v9 = vpop.eup %2014  ;;  %v1310_v60 = vadd.bf16 1065369472, %v2013_v58 }
 0x24a   :  { %v1311_v10 = vadd.bf16 1065369472, %v2015_v9  ;;  %1422 = vmatprep.subr.bf16.mxu1 %v1361_v3  ;;  %v2017_v14 = vpop.eup %2016 }
 0x24b   :  { %v1336_v12 = vmul.bf16 1056980736, %v1310_v60  ;;  %1423 = vmatpush1.bf16.xpose.msra.mxu1 %v1360_v2  ;;  %v2019_v7 = vpop.eup %2018 }
 0x24c   :  { %v1337_v8 = vmul.bf16 1056980736, %v1311_v10 }
 0x24d   :  { %v1362_v16 = vmul.bf16 %v2017_v14, %v1336_v12 }
 0x24e   :  { %v1363_v20 = vmul.bf16 %v2019_v7, %v1337_v8 }
 0x250   :  { %1424 = vmatprep.subr.bf16.mxu1 %v1363_v20 }
 0x253   :  { %1425 = vmatpush1.bf16.xpose.msra.mxu1 %v1362_v16 }
 0x254   :  { %1808 = vmatprep.subr.bf16.mxu1 %v2053_v5 }
 0x25a   :  { %1433 = vmatmul.mubr.bf16.vlgmr.msra.gmra.mrb[52].mxu1 %v1390_v11 }
 0x25b   :  { %1810 = vmatpush1.bf16.msra.mxu1 %v2419_v13  ;;  %v1442_v13 = vand.u32 127, %v654_v23 }
 0x25c   :  { %1811 = vmatprep.subr.bf16.mxu1 %v2053_v5 }
 0x25f   :  { %1813 = vmatpush1.bf16.msra.mxu1 %v2427_v24 }
 0x260   :  { %1814 = vmatprep.subr.bf16.mxu1 %v2053_v5 }
 0x263   :  { %1816 = vmatpush1.bf16.msra.mxu1 %v2435_v35 }
 0x264   :  { %1817 = vmatprep.subr.bf16.mxu1 %v2053_v5 }
 0x267   :  { %1819 = vmatpush1.bf16.msra.mxu1 %v2443_v46  ;;  %v1443_v46 = vadd.s32 128, %v1442_v13 }
 0x268   :  { %1820 = vmatprep.subr.bf16.mxu1 %v2053_v5 }
 0x269   :  { %vm1447_vm1 = vcmp.lt.s32.totalorder %v1443_v46, 200 }
 0x26b   :  { %1822 = vmatpush1.bf16.msra.mxu1 %v2451_v57 }
 0x26c   :  { %1823 = vmatprep.subr.bf16.mxu1 %v2053_v5 }
 0x26f   :  { %1825 = vmatpush1.bf16.msra.mxu1 %v2459_v6 }
 0x270   :  { %1826 = vmatprep.subr.bf16.mxu1 %v2053_v5 }
 0x273   :  { %1828 = vmatpush1.bf16.msra.mxu1 %v2467_v18 }
 0x274   :  { %1829 = vmatprep.subr.bf16.mxu1 %v2053_v5 }
 0x277   :  { %1831 = vmatpush1.bf16.msra.mxu1 %v2475_v30 }
 0x278   :  { %1832 = vmatprep.subr.bf16.mxu1 %v2053_v5 }
 0x27b   :  { %1834 = vmatpush1.bf16.msra.mxu1 %v2483_v42 }
 0x27c   :  { %1835 = vmatprep.subr.bf16.mxu1 %v2053_v5 }
 0x27f   :  { %1837 = vmatpush1.bf16.msra.mxu1 %v2491_v54 }
 0x280   :  { %1838 = vmatprep.subr.bf16.mxu1 %v2053_v5 }
 0x282   :  { %v1369_v24 = vpop.permute.xlu0 %1368 }
 0x283   :  { %1840 = vmatpush1.bf16.msra.mxu1 %v2499_v4  ;;  %v1374_v35 = vrot.slane %v1369_v24, %v2519_v26 }
 0x284   :  { %1841 = vmatprep.subr.bf16.mxu1 %v2053_v5 }
 0x287   :  { %1843 = vmatpush1.bf16.msra.mxu1 %v2507_v17 }
 0x288   :  { %1575 = vmatprep.subr.mxu1 %v2052_v56 }
 0x28b   :  { %1576 = vmatpush1.msra.mxu1 %v2514_v21 }
 0x32d   :  { %v1434_v57 = vpop.f32.mrb[52].mxu1 }
 0x32e   :  { %v1435_v6 = vadd.f32 %v1434_v57, %v1374_v35  ;;  %v1436_v18 = vpop.f32.mrb[53].mxu1 }
 0x32f   :  { %v1437_v30 = vadd.f32 %v1436_v18, %v1374_v35  ;;  %v1438_v42 = vpop.f32.mrb[54].mxu1 }
 0x330   :  { %v1439_v54 = vpop.f32.mrb[55].mxu1  ;;  %v1475_v21 = vsel %vm1474_vm2, %v1435_v6, -inf }
 0x331   :  { %v1449_v4 = vsel %vm1447_vm1, %v1437_v30, -1e+30 }
 0x332   :  { %v1452_v17 = vcombine.low %v1435_v6, %v1449_v4  ;;  %v1477_v32 = vsel %vm1476_vm3, %v1449_v4, -inf }
 0x333   :  { %v1478_v56 = vmax.f32 %v1475_v21, %v1477_v32 }
 0x334   :  { %v1459_v15 = vrot.slane %v1452_v17, %v2536_v38 }
 0x335   :  { %1479 = vmax.xlane.f32.xlu0 %v1478_v56 }
 0x336   :  { %v1466_v25 = vrot.slane %v1459_v15, %v2536_v38 }
 0x338   :  { %1472 = vst.msk [vmem:[#allocation6] sm:$0x3] %vm1470_vm4, %v1466_v25 }
 0x3c2   :  { %v1480_v29 = vpop.xlane.xlu0 %1479 }
 0x3c3   :  { %v1481_v61 = vmax.f32 %v1473_v28, %v1480_v29 }
 0x3c5   :  { %v1482_v31 = vsub.f32 %v1473_v28, %v1481_v61  ;;  %1599 = vst.msk [vmem:[#allocation2] sm:$0x1] %vm79_vm0, %v1481_v61  ;;  %1487 = vperm.xlu1 %1851, %v1481_v61  }
 0x3c7   :  { %v1483_v22 = vmul.f32 1.442695, %v1482_v31 }
 0x3c9   :  { %2020 = vpow2.f32 %v1483_v22 }
 0x3cc   :  { %v1603_v49 = vld [vmem:[#allocation2] sm:$0x1] }
 0x3d3   :  { %v2021_v33 = vpop.eup %2020 }
 0x3d4   :  { %1515 = vperm.xlu0 %1850, %v2021_v33   ;;  %v1503_v51 = vmul.f32 %v2021_v33, %v1502_v50 }
 0x444   :  { %v1488_v27 = vpop.permute.xlu1 %1487 }
 0x445   :  { %v1493_v23 = vrot.slane %v1488_v27, %v2519_v26 }
 0x447   :  { %v1494_v39 = vsub.f32 %v1435_v6, %v1493_v23  ;;  %v1495_v38 = vsub.f32 %v1449_v4, %v1493_v23 }
 0x449   :  { %v1496_v37 = vmul.f32 1.442695, %v1494_v39  ;;  %v1498_v44 = vmul.f32 1.442695, %v1495_v38 }
 0x44b   :  { %2022 = vpow2.f32 %v1496_v37 }
 0x44c   :  { %2024 = vpow2.f32 %v1498_v44 }
 0x455   :  { %v2023_v19 = vpop.eup %2022 }
 0x456   :  { %v2025_v43 = vpop.eup %2024  ;;  %v1504_v47 = vsel %vm1474_vm2, %v2023_v19, 0.0 }
 0x457   :  { %v1501_v34 = vsel %vm1447_vm1, %v2025_v43, 0.0 }
 0x458   :  { %1713 = vmatprep.mubr.msk.f32.mxu1 %vm1523_vm5, %v1501_v34  ;;  %v1505_v40 = vsel %vm1476_vm3, %v1501_v34, 0.0 }
 0x459   :  { %1592 = vmatmul.mubr.f32.vlgmr.msra.gmra.mrb[56].mxu1 %v2023_v19  ;;  %v1506_v36 = vadd.f32 %v1505_v40, %v1504_v47 }
 0x45b   :  { %1507 = vadd.xlane.f32.xlu1 %v1506_v36 }
 0x46c   :  { %1606 = vperm.xlu1 %1851, %v1603_v49  }
 0x4e8   :  { %v1508_v45 = vpop.xlane.xlu1 %1507 }
 0x4e9   :  { %v1509_v41 = vadd.f32 %v1508_v45, %v1503_v51 }
 0x4eb   :  { %1511 = vst.msk [vmem:[#allocation3] sm:$0x1] %vm79_vm0, %v1509_v41 }
 0x4ec   :  { %v1607_v52 = vpop.permute.xlu1 %1606 }
 0x4ed   :  { %v1612_v55 = vrot.slane %v1607_v52, %v2519_v26 }
 0x4ef   :  { %1613 = vst [vmem:[%s2709_s8] sm:$0x1] %v1612_v55 }
 0x4f2   :  { %v1614_v48 = vld [vmem:[#allocation3] sm:$0x1] }
 0x4f3   :  { %1617 = vperm.xlu0 %1850, %v1614_v48  }
 0x4f4   :  { %2037 = shalt.err (!%p2034_p4)
}
 0x4f5   :  { %s2038_s22 = scalar_lea.hbm %s2708_s7, 32 }
 0x4f6   :  { %p2039_p5 = scmp.ne.s32.totalorder %s2708_s7, %s2038_s22  ;;  %p2042_p6 = scmp.lt.u32.totalorder %s2038_s22, %s2708_s7 }
 0x4f8   :  { %p2044_p7 = pnand %p2042_p6, %p2039_p5 }
 0x4fa   :  { %2047 = shalt.err (!%p2044_p7)
}
 0x4fb   :  { %1640 = dma.vmem_to_hbm [thread:$0]  %s1638_s18, 32, %s2708_s7, [#allocation7]   ;;  %v1516_v59 = vpop.permute.xlu0 %1515  ;;  %v1512_v53 = vld [vmem:[#allocation4] sm:$0x1] }
 0x4fc   :  { %v1521_v62 = vrot.slane %v1516_v59, %v2519_v26 }
 0x4fe   :  { %v1522_v0 = vmul.f32 %v1521_v62, %v1512_v53 }
 0x52c   :  { %v1593_v1 = vpop.f32.mrb[56].mxu1 }
 0x52d   :  { %v1597_v2 = vadd.f32 %v1593_v1, %v1522_v0  ;;  %v1595_v58 = vpop.f32.mrb[57].mxu1 }
 0x52f   :  { %1598 = vst [vmem:[#allocation4] sm:$0x1] %v1597_v2 }
 0x536   :  { %v1625_v3 = vld [vmem:[#allocation4] sm:$0x1] }
 0x537   :  { %1626 = vst [vmem:[%s2711_s10] sm:$0x1] %v1625_v3 }
 0x572   :  { %v1618_v9 = vpop.permute.xlu0 %1617 }
 0x573   :  { %v1623_v60 = vrot.slane %v1618_v9, %v2519_v26 }
 0x575   :  { %1624 = vst [vmem:[%s2710_s9] sm:$0x1] %v1623_v60 }
 0x576   :  { %2048 = dma.done.wait [#allocation7], 32  }
 0x577   :  { %2049 = vsyncadd [#allocation7], 4294967264 }
 0x578   :  { %1656 = vsyncpa [#allocation7], 1 }

</bundles_post_ra>
